<compile_context>
chip_gen: v5e
topology: v5e:2x2
jax: 0.10.0
libtpu: 0.0.40
codegen_flags: <defaults>
</compile_context>

<pallas_src>
import functools
import math

import jax
import jax.numpy as jnp
from jax.experimental import pallas as pl
from jax.experimental.pallas import tpu as pltpu


def _pick_strip(tile_l):
    """Largest lane-strip width (<= 512) that divides tile_l."""
    if tile_l <= 512:
        return tile_l
    for s in (512, 384, 256, 128):
        if tile_l % s == 0:
            return s
    return tile_l


def _hope_kernel(dt_ref, sre_ref, sim_ref, hre_ref, him_ref, kre_ref, kim_ref,
                 *, strip):
    """K[h, l] = sum_k H[h, k] * w[h, l]^(k+1),  w = exp(-i*theta[h, l]).

    theta = angle(((1+dt)*s + dt-1) / ((dt-1)*s + dt+1)),  s = exp(2*pi*i*l/L).
    exp(-i*theta) is obtained without trig as conj(c) * rsqrt(|c|^2) with
    c = num * conj(den)  (rsqrt rides the otherwise idle EUP).

    The mode sum uses a real-coefficient Clenshaw recurrence:
        b_k = H_k + 2*cos(theta) * b_{k+1} - b_{k+2}
        K   = w * (b_0 - conj(w) * b_1)
    i.e. 2 mul + 4 add per mode per element (vs. 8 ops for complex Horner).

    The (TH, TL) block is processed in (TH, strip) lane strips through a
    rolled fori_loop so the per-strip live set (~7 planes) stays inside the
    64-vreg file instead of spilling full-tile intermediates to VMEM.
    (A bf16 inner recurrence would double VALU throughput on v6e/v7x but is
    precision-gated over n~32 recurrence steps; kept f32 for the tolerance
    and for v5e which has no bf16 VPU.)
    """
    th = dt_ref.shape[0]
    n = hre_ref.shape[1]
    tl = sre_ref.shape[1]

    dt = dt_ref[...]                       # (TH, 1)
    one_p = 1.0 + dt                       # (TH, 1)
    one_m = dt - 1.0                       # (TH, 1)

    hre = hre_ref[...]                     # (TH, n)
    him = him_ref[...]                     # (TH, n)
    # Hoist the per-mode (TH, 1) coefficient columns out of the strip loop so
    # lane extraction / replication happens once per tile per mode; the
    # Clenshaw adds then consume lane-replicated operands.
    h_cols = [(hre[:, k:k + 1], him[:, k:k + 1]) for k in range(n)]

    def do_strip(off):
        sr = sre_ref[:, pl.ds(off, strip)]                 # (1, STRIP)
        si = sim_ref[:, pl.ds(off, strip)]

        num_re = one_p * sr + one_m                        # (TH, STRIP)
        num_im = one_p * si
        den_re = one_m * sr + one_p
        den_im = one_m * si

        # c = num * conj(den);  w = exp(-i*angle(c)) = conj(c) / |c|
        cr = num_re * den_re + num_im * den_im
        ci = num_im * den_re - num_re * den_im
        inv_mag = jax.lax.rsqrt(cr * cr + ci * ci)         # EUP slot -> ~free
        wr = cr * inv_mag                                  # cos(theta)
        wi = -(ci * inv_mag)                               # -sin(theta)
        c2 = wr + wr                                       # 2*cos(theta)

        # Clenshaw downward recurrence over the static mode dimension.
        shape = (th, strip)
        b1r = jnp.broadcast_to(h_cols[n - 1][0], shape)
        b1i = jnp.broadcast_to(h_cols[n - 1][1], shape)
        b2r = jnp.zeros(shape, jnp.float32)
        b2i = jnp.zeros(shape, jnp.float32)
        for k in range(n - 2, -1, -1):
            hr_k, hi_k = h_cols[k]
            b0r = c2 * b1r - b2r + hr_k
            b0i = c2 * b1i - b2i + hi_k
            b2r, b2i = b1r, b1i
            b1r, b1i = b0r, b0i

        # K = w * (b_0 - conj(w) * b_1);  (b1r,b1i) = b_0, (b2r,b2i) = b_1.
        tr = b1r - (wr * b2r + wi * b2i)
        ti = b1i - (wr * b2i - wi * b2r)
        kre_ref[:, pl.ds(off, strip)] = wr * tr - wi * ti
        kim_ref[:, pl.ds(off, strip)] = wr * ti + wi * tr

    n_strips = tl // strip
    if n_strips <= 1:
        do_strip(0)
    else:
        # Rolled loop (not Python-unrolled) to bound live ranges per strip.
        def body(s, carry):
            do_strip(pl.multiple_of(s * strip, strip))
            return carry
        jax.lax.fori_loop(0, n_strips, body, 0)


def hope_ssm_kernel(log_dt, H_re, H_im, L, *, tile_h=8, tile_l=2048,
                    return_complex=True):
    """Pallas implementation of HOPE_SSM_Kernel.forward(L).

    Default returns complex64 (h, L) for module parity.  With
    return_complex=False it returns the planar (K_re, K_im) float32 planes,
    skipping the extra HBM round trip of the complex repack (preferred when
    the consumer, e.g. an FFT-based convolution, accepts planar inputs).
    """
    h = log_dt.shape[0]
    n = H_re.shape[1]

    tile_h = min(tile_h, h)
    tile_l = min(tile_l, L)
    # v7x has two TensorCores per chip: make sure small problems still expose
    # at least two parallel grid steps by splitting L.
    if (h // tile_h) * (L // tile_l) < 2 and tile_l >= 256 and L % 256 == 0:
        tile_l = min(tile_l, max(128, ((L // 2) // 128) * 128))

    # TODO(synk): pad / pl.cdiv-based ragged handling for non-dividing shapes.
    assert h % tile_h == 0, (h, tile_h)
    assert L % tile_l == 0, (L, tile_l)
    assert tile_l == L or tile_l % 128 == 0, tile_l
    assert tile_h == h or tile_h % 8 == 0, tile_h

    strip = _pick_strip(tile_l)

    # Only O(h) / O(L) preprocessing stays outside the kernel: dt per channel
    # and the unit-circle sampler, streamed as (h, 1) and (1, L).
    dt = jnp.exp(log_dt).astype(jnp.float32)[:, None]                   # (h, 1)
    phi = (2.0 * math.pi / L) * jnp.arange(L, dtype=jnp.float32)
    s_re = jnp.cos(phi)[None, :]                                        # (1, L)
    s_im = jnp.sin(phi)[None, :]

    grid = (h // tile_h, L // tile_l)

    kre, kim = pl.pallas_call(
        functools.partial(_hope_kernel, strip=strip),
        out_shape=(jax.ShapeDtypeStruct((h, L), jnp.float32),
                   jax.ShapeDtypeStruct((h, L), jnp.float32)),
        grid=grid,
        in_specs=[
            pl.BlockSpec((tile_h, 1), lambda i, j: (i, 0)),       # dt
            pl.BlockSpec((1, tile_l), lambda i, j: (0, j)),       # Re(sampler)
            pl.BlockSpec((1, tile_l), lambda i, j: (0, j)),       # Im(sampler)
            pl.BlockSpec((tile_h, n), lambda i, j: (i, 0)),       # Re(H)
            pl.BlockSpec((tile_h, n), lambda i, j: (i, 0)),       # Im(H)
        ],
        out_specs=(
            pl.BlockSpec((tile_h, tile_l), lambda i, j: (i, j)),
            pl.BlockSpec((tile_h, tile_l), lambda i, j: (i, j)),
        ),
        # Rely on the default scoped VMEM budget (tiles are only ~100s of KB,
        # double-buffered) so the same config runs on v5e/v6e/v7x.
        compiler_params=pltpu.CompilerParams(
            dimension_semantics=("parallel", "parallel")),
        cost_estimate=pl.CostEstimate(
            flops=int(h * L * (6 * n + 26)),
            transcendentals=int(h * L),
            bytes_accessed=int(4 * (h + 2 * L + 2 * h * n + 2 * h * L))),
    )(dt, s_re, s_im, H_re.astype(jnp.float32), H_im.astype(jnp.float32))

    if return_complex:
        # Mosaic has no complex dtype; module-parity repack happens outside
        # the kernel (one extra XLA op over the (h, L) output).
        return jax.lax.complex(kre, kim)
    return kre, kim


def hope_ssm_ref(log_dt, H_re, H_im, L):
    """Plain-JAX reference mirroring the PyTorch forward (complex math)."""
    h, n = H_re.shape
    dt = jnp.exp(log_dt)
    phi = 2.0 * jnp.pi * jnp.arange(L, dtype=jnp.float32) / L
    samplers = jnp.broadcast_to(jnp.exp(1j * phi)[None, :], (h, L))
    dte = dt[:, None]
    s_dt = ((1 + dte) * samplers + dte - 1) / ((dte - 1) * samplers + dte + 1)
    ang = jnp.angle(s_dt)                                               # (h, L)
    enumer = -(jnp.arange(n, dtype=ang.dtype) + 1.0)                    # (n,)
    W = jnp.exp(1j * ang[..., None] * enumer)                           # (h, L, n)
    H = H_re + 1j * H_im
    return jnp.einsum('hn,hln->hl', H, W)


def _make_params(key, d_model, N, dt_min=1e-4, dt_max=0.1):
    n = N // 2
    k1, k2, k3 = jax.random.split(key, 3)
    log_dt = (jax.random.uniform(k1, (d_model,), dtype=jnp.float32)
              * (math.log(dt_max) - math.log(dt_min)) + math.log(dt_min))
    H_re = jax.random.normal(k2, (d_model, n), dtype=jnp.float32) / math.sqrt(N) / 2
    H_im = jax.random.normal(k3, (d_model, n), dtype=jnp.float32) / math.sqrt(N) / 2
    return log_dt, H_re, H_im


if __name__ == "__main__":
    key = jax.random.PRNGKey(0)

    # --- Case 1: small shapes consistent with the module (d_model=8, N=64,
    # L=256).  Exercises the single-strip path (grid split for 2 TCs).
    d_model, N, L = 8, 64, 256
    log_dt, H_re, H_im = _make_params(key, d_model, N)

    kre, kim = hope_ssm_kernel(log_dt, H_re, H_im, L, return_complex=False)
    kre, kim = jax.block_until_ready((kre, kim))

    K_ref = hope_ssm_ref(log_dt, H_re, H_im, L)
    err1 = max(float(jnp.max(jnp.abs(kre - K_ref.real))),
               float(jnp.max(jnp.abs(kim - K_ref.imag))))
    assert kre.shape == (d_model, L) and kim.shape == (d_model, L)
    assert err1 < 1e-3, f"case1 max abs error {err1}"

    # Module-compatible complex output path (single repack for API parity).
    K = hope_ssm_kernel(log_dt, H_re, H_im, L)
    K = jax.block_until_ready(K)
    assert K.shape == (d_model, L) and K.dtype == jnp.complex64

    # --- Case 2: moderate shape to exercise the multi-strip / multi-tile
    # path (tile_l=2048, 4 lane strips per tile, grid=(2,2)).
    d_model2, L2 = 16, 4096
    log_dt2, H_re2, H_im2 = _make_params(jax.random.PRNGKey(1), d_model2, N)
    kre2, kim2 = hope_ssm_kernel(log_dt2, H_re2, H_im2, L2, return_complex=False)
    kre2, kim2 = jax.block_until_ready((kre2, kim2))
    K_ref2 = hope_ssm_ref(log_dt2, H_re2, H_im2, L2)
    err2 = max(float(jnp.max(jnp.abs(kre2 - K_ref2.real))),
               float(jnp.max(jnp.abs(kim2 - K_ref2.imag))))
    assert err2 < 1e-3, f"case2 max abs error {err2}"

    print("KERNEL_OK")
</pallas_src>

<mosaic_0001>
module attributes {stable_mosaic.version = 11 : i64} {
  func.func @_hope_kernel(%arg0: i32, %arg1: i32, %arg2: memref<8x1xf32, #tpu.memory_space<vmem>>, %arg3: memref<1x128xf32, #tpu.memory_space<vmem>>, %arg4: memref<1x128xf32, #tpu.memory_space<vmem>>, %arg5: memref<8x32xf32, #tpu.memory_space<vmem>>, %arg6: memref<8x32xf32, #tpu.memory_space<vmem>>, %arg7: memref<8x128xf32, #tpu.memory_space<vmem>>, %arg8: memref<8x128xf32, #tpu.memory_space<vmem>>) attributes {dimension_semantics = [#tpu.dimension_semantics<parallel>, #tpu.dimension_semantics<parallel>], iteration_bounds = array<i64: 1, 2>, scalar_prefetch = 0 : i64, scratch_operands = 0 : i64, tpu.core_type = #tpu.core_type<tc>, window_params = [{transform_indices = @transform_0, window_bounds = array<i64: 8, 1>}, {transform_indices = @transform_1, window_bounds = array<i64: 1, 128>}, {transform_indices = @transform_2, window_bounds = array<i64: 1, 128>}, {transform_indices = @transform_3, window_bounds = array<i64: 8, 32>}, {transform_indices = @transform_4, window_bounds = array<i64: 8, 32>}, {transform_indices = @transform_5, window_bounds = array<i64: 8, 128>}, {transform_indices = @transform_6, window_bounds = array<i64: 8, 128>}]} {
    %c0 = arith.constant 0 : index
    %c0_0 = arith.constant 0 : index
    %0 = vector.load %arg2[%c0, %c0_0] : memref<8x1xf32, #tpu.memory_space<vmem>>, vector<8x1xf32>
    %cst = arith.constant 1.000000e+00 : f32
    %1 = vector.broadcast %cst : f32 to vector<8x1xf32>
    %2 = arith.addf %1, %0 : vector<8x1xf32>
    %cst_1 = arith.constant 1.000000e+00 : f32
    %3 = vector.broadcast %cst_1 : f32 to vector<8x1xf32>
    %4 = arith.subf %0, %3 : vector<8x1xf32>
    %c0_2 = arith.constant 0 : index
    %c0_3 = arith.constant 0 : index
    %5 = vector.load %arg5[%c0_2, %c0_3] : memref<8x32xf32, #tpu.memory_space<vmem>>, vector<8x32xf32>
    %c0_4 = arith.constant 0 : index
    %c0_5 = arith.constant 0 : index
    %6 = vector.load %arg6[%c0_4, %c0_5] : memref<8x32xf32, #tpu.memory_space<vmem>>, vector<8x32xf32>
    %7 = vector.extract_strided_slice %5 {offsets = [0, 0], sizes = [8, 1], strides = [1, 1]} : vector<8x32xf32> to vector<8x1xf32>
    %8 = vector.extract_strided_slice %6 {offsets = [0, 0], sizes = [8, 1], strides = [1, 1]} : vector<8x32xf32> to vector<8x1xf32>
    %9 = vector.extract_strided_slice %5 {offsets = [0, 1], sizes = [8, 1], strides = [1, 1]} : vector<8x32xf32> to vector<8x1xf32>
    %10 = vector.extract_strided_slice %6 {offsets = [0, 1], sizes = [8, 1], strides = [1, 1]} : vector<8x32xf32> to vector<8x1xf32>
    %11 = vector.extract_strided_slice %5 {offsets = [0, 2], sizes = [8, 1], strides = [1, 1]} : vector<8x32xf32> to vector<8x1xf32>
    %12 = vector.extract_strided_slice %6 {offsets = [0, 2], sizes = [8, 1], strides = [1, 1]} : vector<8x32xf32> to vector<8x1xf32>
    %13 = vector.extract_strided_slice %5 {offsets = [0, 3], sizes = [8, 1], strides = [1, 1]} : vector<8x32xf32> to vector<8x1xf32>
    %14 = vector.extract_strided_slice %6 {offsets = [0, 3], sizes = [8, 1], strides = [1, 1]} : vector<8x32xf32> to vector<8x1xf32>
    %15 = vector.extract_strided_slice %5 {offsets = [0, 4], sizes = [8, 1], strides = [1, 1]} : vector<8x32xf32> to vector<8x1xf32>
    %16 = vector.extract_strided_slice %6 {offsets = [0, 4], sizes = [8, 1], strides = [1, 1]} : vector<8x32xf32> to vector<8x1xf32>
    %17 = vector.extract_strided_slice %5 {offsets = [0, 5], sizes = [8, 1], strides = [1, 1]} : vector<8x32xf32> to vector<8x1xf32>
    %18 = vector.extract_strided_slice %6 {offsets = [0, 5], sizes = [8, 1], strides = [1, 1]} : vector<8x32xf32> to vector<8x1xf32>
    %19 = vector.extract_strided_slice %5 {offsets = [0, 6], sizes = [8, 1], strides = [1, 1]} : vector<8x32xf32> to vector<8x1xf32>
    %20 = vector.extract_strided_slice %6 {offsets = [0, 6], sizes = [8, 1], strides = [1, 1]} : vector<8x32xf32> to vector<8x1xf32>
    %21 = vector.extract_strided_slice %5 {offsets = [0, 7], sizes = [8, 1], strides = [1, 1]} : vector<8x32xf32> to vector<8x1xf32>
    %22 = vector.extract_strided_slice %6 {offsets = [0, 7], sizes = [8, 1], strides = [1, 1]} : vector<8x32xf32> to vector<8x1xf32>
    %23 = vector.extract_strided_slice %5 {offsets = [0, 8], sizes = [8, 1], strides = [1, 1]} : vector<8x32xf32> to vector<8x1xf32>
    %24 = vector.extract_strided_slice %6 {offsets = [0, 8], sizes = [8, 1], strides = [1, 1]} : vector<8x32xf32> to vector<8x1xf32>
    %25 = vector.extract_strided_slice %5 {offsets = [0, 9], sizes = [8, 1], strides = [1, 1]} : vector<8x32xf32> to vector<8x1xf32>
    %26 = vector.extract_strided_slice %6 {offsets = [0, 9], sizes = [8, 1], strides = [1, 1]} : vector<8x32xf32> to vector<8x1xf32>
    %27 = vector.extract_strided_slice %5 {offsets = [0, 10], sizes = [8, 1], strides = [1, 1]} : vector<8x32xf32> to vector<8x1xf32>
    %28 = vector.extract_strided_slice %6 {offsets = [0, 10], sizes = [8, 1], strides = [1, 1]} : vector<8x32xf32> to vector<8x1xf32>
    %29 = vector.extract_strided_slice %5 {offsets = [0, 11], sizes = [8, 1], strides = [1, 1]} : vector<8x32xf32> to vector<8x1xf32>
    %30 = vector.extract_strided_slice %6 {offsets = [0, 11], sizes = [8, 1], strides = [1, 1]} : vector<8x32xf32> to vector<8x1xf32>
    %31 = vector.extract_strided_slice %5 {offsets = [0, 12], sizes = [8, 1], strides = [1, 1]} : vector<8x32xf32> to vector<8x1xf32>
    %32 = vector.extract_strided_slice %6 {offsets = [0, 12], sizes = [8, 1], strides = [1, 1]} : vector<8x32xf32> to vector<8x1xf32>
    %33 = vector.extract_strided_slice %5 {offsets = [0, 13], sizes = [8, 1], strides = [1, 1]} : vector<8x32xf32> to vector<8x1xf32>
    %34 = vector.extract_strided_slice %6 {offsets = [0, 13], sizes = [8, 1], strides = [1, 1]} : vector<8x32xf32> to vector<8x1xf32>
    %35 = vector.extract_strided_slice %5 {offsets = [0, 14], sizes = [8, 1], strides = [1, 1]} : vector<8x32xf32> to vector<8x1xf32>
    %36 = vector.extract_strided_slice %6 {offsets = [0, 14], sizes = [8, 1], strides = [1, 1]} : vector<8x32xf32> to vector<8x1xf32>
    %37 = vector.extract_strided_slice %5 {offsets = [0, 15], sizes = [8, 1], strides = [1, 1]} : vector<8x32xf32> to vector<8x1xf32>
    %38 = vector.extract_strided_slice %6 {offsets = [0, 15], sizes = [8, 1], strides = [1, 1]} : vector<8x32xf32> to vector<8x1xf32>
    %39 = vector.extract_strided_slice %5 {offsets = [0, 16], sizes = [8, 1], strides = [1, 1]} : vector<8x32xf32> to vector<8x1xf32>
    %40 = vector.extract_strided_slice %6 {offsets = [0, 16], sizes = [8, 1], strides = [1, 1]} : vector<8x32xf32> to vector<8x1xf32>
    %41 = vector.extract_strided_slice %5 {offsets = [0, 17], sizes = [8, 1], strides = [1, 1]} : vector<8x32xf32> to vector<8x1xf32>
    %42 = vector.extract_strided_slice %6 {offsets = [0, 17], sizes = [8, 1], strides = [1, 1]} : vector<8x32xf32> to vector<8x1xf32>
    %43 = vector.extract_strided_slice %5 {offsets = [0, 18], sizes = [8, 1], strides = [1, 1]} : vector<8x32xf32> to vector<8x1xf32>
    %44 = vector.extract_strided_slice %6 {offsets = [0, 18], sizes = [8, 1], strides = [1, 1]} : vector<8x32xf32> to vector<8x1xf32>
    %45 = vector.extract_strided_slice %5 {offsets = [0, 19], sizes = [8, 1], strides = [1, 1]} : vector<8x32xf32> to vector<8x1xf32>
    %46 = vector.extract_strided_slice %6 {offsets = [0, 19], sizes = [8, 1], strides = [1, 1]} : vector<8x32xf32> to vector<8x1xf32>
    %47 = vector.extract_strided_slice %5 {offsets = [0, 20], sizes = [8, 1], strides = [1, 1]} : vector<8x32xf32> to vector<8x1xf32>
    %48 = vector.extract_strided_slice %6 {offsets = [0, 20], sizes = [8, 1], strides = [1, 1]} : vector<8x32xf32> to vector<8x1xf32>
    %49 = vector.extract_strided_slice %5 {offsets = [0, 21], sizes = [8, 1], strides = [1, 1]} : vector<8x32xf32> to vector<8x1xf32>
    %50 = vector.extract_strided_slice %6 {offsets = [0, 21], sizes = [8, 1], strides = [1, 1]} : vector<8x32xf32> to vector<8x1xf32>
    %51 = vector.extract_strided_slice %5 {offsets = [0, 22], sizes = [8, 1], strides = [1, 1]} : vector<8x32xf32> to vector<8x1xf32>
    %52 = vector.extract_strided_slice %6 {offsets = [0, 22], sizes = [8, 1], strides = [1, 1]} : vector<8x32xf32> to vector<8x1xf32>
    %53 = vector.extract_strided_slice %5 {offsets = [0, 23], sizes = [8, 1], strides = [1, 1]} : vector<8x32xf32> to vector<8x1xf32>
    %54 = vector.extract_strided_slice %6 {offsets = [0, 23], sizes = [8, 1], strides = [1, 1]} : vector<8x32xf32> to vector<8x1xf32>
    %55 = vector.extract_strided_slice %5 {offsets = [0, 24], sizes = [8, 1], strides = [1, 1]} : vector<8x32xf32> to vector<8x1xf32>
    %56 = vector.extract_strided_slice %6 {offsets = [0, 24], sizes = [8, 1], strides = [1, 1]} : vector<8x32xf32> to vector<8x1xf32>
    %57 = vector.extract_strided_slice %5 {offsets = [0, 25], sizes = [8, 1], strides = [1, 1]} : vector<8x32xf32> to vector<8x1xf32>
    %58 = vector.extract_strided_slice %6 {offsets = [0, 25], sizes = [8, 1], strides = [1, 1]} : vector<8x32xf32> to vector<8x1xf32>
    %59 = vector.extract_strided_slice %5 {offsets = [0, 26], sizes = [8, 1], strides = [1, 1]} : vector<8x32xf32> to vector<8x1xf32>
    %60 = vector.extract_strided_slice %6 {offsets = [0, 26], sizes = [8, 1], strides = [1, 1]} : vector<8x32xf32> to vector<8x1xf32>
    %61 = vector.extract_strided_slice %5 {offsets = [0, 27], sizes = [8, 1], strides = [1, 1]} : vector<8x32xf32> to vector<8x1xf32>
    %62 = vector.extract_strided_slice %6 {offsets = [0, 27], sizes = [8, 1], strides = [1, 1]} : vector<8x32xf32> to vector<8x1xf32>
    %63 = vector.extract_strided_slice %5 {offsets = [0, 28], sizes = [8, 1], strides = [1, 1]} : vector<8x32xf32> to vector<8x1xf32>
    %64 = vector.extract_strided_slice %6 {offsets = [0, 28], sizes = [8, 1], strides = [1, 1]} : vector<8x32xf32> to vector<8x1xf32>
    %65 = vector.extract_strided_slice %5 {offsets = [0, 29], sizes = [8, 1], strides = [1, 1]} : vector<8x32xf32> to vector<8x1xf32>
    %66 = vector.extract_strided_slice %6 {offsets = [0, 29], sizes = [8, 1], strides = [1, 1]} : vector<8x32xf32> to vector<8x1xf32>
    %67 = vector.extract_strided_slice %5 {offsets = [0, 30], sizes = [8, 1], strides = [1, 1]} : vector<8x32xf32> to vector<8x1xf32>
    %68 = vector.extract_strided_slice %6 {offsets = [0, 30], sizes = [8, 1], strides = [1, 1]} : vector<8x32xf32> to vector<8x1xf32>
    %69 = vector.extract_strided_slice %5 {offsets = [0, 31], sizes = [8, 1], strides = [1, 1]} : vector<8x32xf32> to vector<8x1xf32>
    %70 = vector.extract_strided_slice %6 {offsets = [0, 31], sizes = [8, 1], strides = [1, 1]} : vector<8x32xf32> to vector<8x1xf32>
    %c0_6 = arith.constant 0 : index
    %c0_7 = arith.constant 0 : index
    %71 = vector.load %arg3[%c0_6, %c0_7] : memref<1x128xf32, #tpu.memory_space<vmem>>, vector<1x128xf32>
    %c0_8 = arith.constant 0 : index
    %c0_9 = arith.constant 0 : index
    %72 = vector.load %arg4[%c0_8, %c0_9] : memref<1x128xf32, #tpu.memory_space<vmem>>, vector<1x128xf32>
    %73 = vector.broadcast %2 : vector<8x1xf32> to vector<8x128xf32>
    %74 = vector.broadcast %71 : vector<1x128xf32> to vector<8x128xf32>
    %75 = arith.mulf %73, %74 : vector<8x128xf32>
    %76 = vector.broadcast %4 : vector<8x1xf32> to vector<8x128xf32>
    %77 = arith.addf %75, %76 : vector<8x128xf32>
    %78 = vector.broadcast %2 : vector<8x1xf32> to vector<8x128xf32>
    %79 = vector.broadcast %72 : vector<1x128xf32> to vector<8x128xf32>
    %80 = arith.mulf %78, %79 : vector<8x128xf32>
    %81 = vector.broadcast %4 : vector<8x1xf32> to vector<8x128xf32>
    %82 = vector.broadcast %71 : vector<1x128xf32> to vector<8x128xf32>
    %83 = arith.mulf %81, %82 : vector<8x128xf32>
    %84 = vector.broadcast %2 : vector<8x1xf32> to vector<8x128xf32>
    %85 = arith.addf %83, %84 : vector<8x128xf32>
    %86 = vector.broadcast %4 : vector<8x1xf32> to vector<8x128xf32>
    %87 = vector.broadcast %72 : vector<1x128xf32> to vector<8x128xf32>
    %88 = arith.mulf %86, %87 : vector<8x128xf32>
    %89 = arith.mulf %77, %85 : vector<8x128xf32>
    %90 = arith.mulf %80, %88 : vector<8x128xf32>
    %91 = arith.addf %89, %90 : vector<8x128xf32>
    %92 = arith.mulf %80, %85 : vector<8x128xf32>
    %93 = arith.mulf %77, %88 : vector<8x128xf32>
    %94 = arith.subf %92, %93 : vector<8x128xf32>
    %95 = arith.mulf %91, %91 : vector<8x128xf32>
    %96 = arith.mulf %94, %94 : vector<8x128xf32>
    %97 = arith.addf %95, %96 : vector<8x128xf32>
    %98 = math.rsqrt %97 : vector<8x128xf32>
    %99 = arith.mulf %91, %98 : vector<8x128xf32>
    %100 = arith.mulf %94, %98 : vector<8x128xf32>
    %cst_10 = arith.constant 0.000000e+00 : f32
    %101 = vector.broadcast %cst_10 : f32 to vector<8x128xf32>
    %102 = arith.subf %101, %100 : vector<8x128xf32>
    %103 = arith.addf %99, %99 : vector<8x128xf32>
    %104 = vector.shape_cast %69 : vector<8x1xf32> to vector<8x1xf32>
    %105 = vector.broadcast %104 : vector<8x1xf32> to vector<8x128xf32>
    %106 = vector.shape_cast %70 : vector<8x1xf32> to vector<8x1xf32>
    %107 = vector.broadcast %106 : vector<8x1xf32> to vector<8x128xf32>
    %cst_11 = arith.constant 0.000000e+00 : f32
    %108 = vector.broadcast %cst_11 : f32 to vector<8x128xf32>
    %cst_12 = arith.constant 0.000000e+00 : f32
    %109 = vector.broadcast %cst_12 : f32 to vector<8x128xf32>
    %110 = arith.mulf %103, %105 : vector<8x128xf32>
    %111 = arith.subf %110, %108 : vector<8x128xf32>
    %112 = vector.broadcast %67 : vector<8x1xf32> to vector<8x128xf32>
    %113 = arith.addf %111, %112 : vector<8x128xf32>
    %114 = arith.mulf %103, %107 : vector<8x128xf32>
    %115 = arith.subf %114, %109 : vector<8x128xf32>
    %116 = vector.broadcast %68 : vector<8x1xf32> to vector<8x128xf32>
    %117 = arith.addf %115, %116 : vector<8x128xf32>
    %118 = arith.mulf %103, %113 : vector<8x128xf32>
    %119 = arith.subf %118, %105 : vector<8x128xf32>
    %120 = vector.broadcast %65 : vector<8x1xf32> to vector<8x128xf32>
    %121 = arith.addf %119, %120 : vector<8x128xf32>
    %122 = arith.mulf %103, %117 : vector<8x128xf32>
    %123 = arith.subf %122, %107 : vector<8x128xf32>
    %124 = vector.broadcast %66 : vector<8x1xf32> to vector<8x128xf32>
    %125 = arith.addf %123, %124 : vector<8x128xf32>
    %126 = arith.mulf %103, %121 : vector<8x128xf32>
    %127 = arith.subf %126, %113 : vector<8x128xf32>
    %128 = vector.broadcast %63 : vector<8x1xf32> to vector<8x128xf32>
    %129 = arith.addf %127, %128 : vector<8x128xf32>
    %130 = arith.mulf %103, %125 : vector<8x128xf32>
    %131 = arith.subf %130, %117 : vector<8x128xf32>
    %132 = vector.broadcast %64 : vector<8x1xf32> to vector<8x128xf32>
    %133 = arith.addf %131, %132 : vector<8x128xf32>
    %134 = arith.mulf %103, %129 : vector<8x128xf32>
    %135 = arith.subf %134, %121 : vector<8x128xf32>
    %136 = vector.broadcast %61 : vector<8x1xf32> to vector<8x128xf32>
    %137 = arith.addf %135, %136 : vector<8x128xf32>
    %138 = arith.mulf %103, %133 : vector<8x128xf32>
    %139 = arith.subf %138, %125 : vector<8x128xf32>
    %140 = vector.broadcast %62 : vector<8x1xf32> to vector<8x128xf32>
    %141 = arith.addf %139, %140 : vector<8x128xf32>
    %142 = arith.mulf %103, %137 : vector<8x128xf32>
    %143 = arith.subf %142, %129 : vector<8x128xf32>
    %144 = vector.broadcast %59 : vector<8x1xf32> to vector<8x128xf32>
    %145 = arith.addf %143, %144 : vector<8x128xf32>
    %146 = arith.mulf %103, %141 : vector<8x128xf32>
    %147 = arith.subf %146, %133 : vector<8x128xf32>
    %148 = vector.broadcast %60 : vector<8x1xf32> to vector<8x128xf32>
    %149 = arith.addf %147, %148 : vector<8x128xf32>
    %150 = arith.mulf %103, %145 : vector<8x128xf32>
    %151 = arith.subf %150, %137 : vector<8x128xf32>
    %152 = vector.broadcast %57 : vector<8x1xf32> to vector<8x128xf32>
    %153 = arith.addf %151, %152 : vector<8x128xf32>
    %154 = arith.mulf %103, %149 : vector<8x128xf32>
    %155 = arith.subf %154, %141 : vector<8x128xf32>
    %156 = vector.broadcast %58 : vector<8x1xf32> to vector<8x128xf32>
    %157 = arith.addf %155, %156 : vector<8x128xf32>
    %158 = arith.mulf %103, %153 : vector<8x128xf32>
    %159 = arith.subf %158, %145 : vector<8x128xf32>
    %160 = vector.broadcast %55 : vector<8x1xf32> to vector<8x128xf32>
    %161 = arith.addf %159, %160 : vector<8x128xf32>
    %162 = arith.mulf %103, %157 : vector<8x128xf32>
    %163 = arith.subf %162, %149 : vector<8x128xf32>
    %164 = vector.broadcast %56 : vector<8x1xf32> to vector<8x128xf32>
    %165 = arith.addf %163, %164 : vector<8x128xf32>
    %166 = arith.mulf %103, %161 : vector<8x128xf32>
    %167 = arith.subf %166, %153 : vector<8x128xf32>
    %168 = vector.broadcast %53 : vector<8x1xf32> to vector<8x128xf32>
    %169 = arith.addf %167, %168 : vector<8x128xf32>
    %170 = arith.mulf %103, %165 : vector<8x128xf32>
    %171 = arith.subf %170, %157 : vector<8x128xf32>
    %172 = vector.broadcast %54 : vector<8x1xf32> to vector<8x128xf32>
    %173 = arith.addf %171, %172 : vector<8x128xf32>
    %174 = arith.mulf %103, %169 : vector<8x128xf32>
    %175 = arith.subf %174, %161 : vector<8x128xf32>
    %176 = vector.broadcast %51 : vector<8x1xf32> to vector<8x128xf32>
    %177 = arith.addf %175, %176 : vector<8x128xf32>
    %178 = arith.mulf %103, %173 : vector<8x128xf32>
    %179 = arith.subf %178, %165 : vector<8x128xf32>
    %180 = vector.broadcast %52 : vector<8x1xf32> to vector<8x128xf32>
    %181 = arith.addf %179, %180 : vector<8x128xf32>
    %182 = arith.mulf %103, %177 : vector<8x128xf32>
    %183 = arith.subf %182, %169 : vector<8x128xf32>
    %184 = vector.broadcast %49 : vector<8x1xf32> to vector<8x128xf32>
    %185 = arith.addf %183, %184 : vector<8x128xf32>
    %186 = arith.mulf %103, %181 : vector<8x128xf32>
    %187 = arith.subf %186, %173 : vector<8x128xf32>
    %188 = vector.broadcast %50 : vector<8x1xf32> to vector<8x128xf32>
    %189 = arith.addf %187, %188 : vector<8x128xf32>
    %190 = arith.mulf %103, %185 : vector<8x128xf32>
    %191 = arith.subf %190, %177 : vector<8x128xf32>
    %192 = vector.broadcast %47 : vector<8x1xf32> to vector<8x128xf32>
    %193 = arith.addf %191, %192 : vector<8x128xf32>
    %194 = arith.mulf %103, %189 : vector<8x128xf32>
    %195 = arith.subf %194, %181 : vector<8x128xf32>
    %196 = vector.broadcast %48 : vector<8x1xf32> to vector<8x128xf32>
    %197 = arith.addf %195, %196 : vector<8x128xf32>
    %198 = arith.mulf %103, %193 : vector<8x128xf32>
    %199 = arith.subf %198, %185 : vector<8x128xf32>
    %200 = vector.broadcast %45 : vector<8x1xf32> to vector<8x128xf32>
    %201 = arith.addf %199, %200 : vector<8x128xf32>
    %202 = arith.mulf %103, %197 : vector<8x128xf32>
    %203 = arith.subf %202, %189 : vector<8x128xf32>
    %204 = vector.broadcast %46 : vector<8x1xf32> to vector<8x128xf32>
    %205 = arith.addf %203, %204 : vector<8x128xf32>
    %206 = arith.mulf %103, %201 : vector<8x128xf32>
    %207 = arith.subf %206, %193 : vector<8x128xf32>
    %208 = vector.broadcast %43 : vector<8x1xf32> to vector<8x128xf32>
    %209 = arith.addf %207, %208 : vector<8x128xf32>
    %210 = arith.mulf %103, %205 : vector<8x128xf32>
    %211 = arith.subf %210, %197 : vector<8x128xf32>
    %212 = vector.broadcast %44 : vector<8x1xf32> to vector<8x128xf32>
    %213 = arith.addf %211, %212 : vector<8x128xf32>
    %214 = arith.mulf %103, %209 : vector<8x128xf32>
    %215 = arith.subf %214, %201 : vector<8x128xf32>
    %216 = vector.broadcast %41 : vector<8x1xf32> to vector<8x128xf32>
    %217 = arith.addf %215, %216 : vector<8x128xf32>
    %218 = arith.mulf %103, %213 : vector<8x128xf32>
    %219 = arith.subf %218, %205 : vector<8x128xf32>
    %220 = vector.broadcast %42 : vector<8x1xf32> to vector<8x128xf32>
    %221 = arith.addf %219, %220 : vector<8x128xf32>
    %222 = arith.mulf %103, %217 : vector<8x128xf32>
    %223 = arith.subf %222, %209 : vector<8x128xf32>
    %224 = vector.broadcast %39 : vector<8x1xf32> to vector<8x128xf32>
    %225 = arith.addf %223, %224 : vector<8x128xf32>
    %226 = arith.mulf %103, %221 : vector<8x128xf32>
    %227 = arith.subf %226, %213 : vector<8x128xf32>
    %228 = vector.broadcast %40 : vector<8x1xf32> to vector<8x128xf32>
    %229 = arith.addf %227, %228 : vector<8x128xf32>
    %230 = arith.mulf %103, %225 : vector<8x128xf32>
    %231 = arith.subf %230, %217 : vector<8x128xf32>
    %232 = vector.broadcast %37 : vector<8x1xf32> to vector<8x128xf32>
    %233 = arith.addf %231, %232 : vector<8x128xf32>
    %234 = arith.mulf %103, %229 : vector<8x128xf32>
    %235 = arith.subf %234, %221 : vector<8x128xf32>
    %236 = vector.broadcast %38 : vector<8x1xf32> to vector<8x128xf32>
    %237 = arith.addf %235, %236 : vector<8x128xf32>
    %238 = arith.mulf %103, %233 : vector<8x128xf32>
    %239 = arith.subf %238, %225 : vector<8x128xf32>
    %240 = vector.broadcast %35 : vector<8x1xf32> to vector<8x128xf32>
    %241 = arith.addf %239, %240 : vector<8x128xf32>
    %242 = arith.mulf %103, %237 : vector<8x128xf32>
    %243 = arith.subf %242, %229 : vector<8x128xf32>
    %244 = vector.broadcast %36 : vector<8x1xf32> to vector<8x128xf32>
    %245 = arith.addf %243, %244 : vector<8x128xf32>
    %246 = arith.mulf %103, %241 : vector<8x128xf32>
    %247 = arith.subf %246, %233 : vector<8x128xf32>
    %248 = vector.broadcast %33 : vector<8x1xf32> to vector<8x128xf32>
    %249 = arith.addf %247, %248 : vector<8x128xf32>
    %250 = arith.mulf %103, %245 : vector<8x128xf32>
    %251 = arith.subf %250, %237 : vector<8x128xf32>
    %252 = vector.broadcast %34 : vector<8x1xf32> to vector<8x128xf32>
    %253 = arith.addf %251, %252 : vector<8x128xf32>
    %254 = arith.mulf %103, %249 : vector<8x128xf32>
    %255 = arith.subf %254, %241 : vector<8x128xf32>
    %256 = vector.broadcast %31 : vector<8x1xf32> to vector<8x128xf32>
    %257 = arith.addf %255, %256 : vector<8x128xf32>
    %258 = arith.mulf %103, %253 : vector<8x128xf32>
    %259 = arith.subf %258, %245 : vector<8x128xf32>
    %260 = vector.broadcast %32 : vector<8x1xf32> to vector<8x128xf32>
    %261 = arith.addf %259, %260 : vector<8x128xf32>
    %262 = arith.mulf %103, %257 : vector<8x128xf32>
    %263 = arith.subf %262, %249 : vector<8x128xf32>
    %264 = vector.broadcast %29 : vector<8x1xf32> to vector<8x128xf32>
    %265 = arith.addf %263, %264 : vector<8x128xf32>
    %266 = arith.mulf %103, %261 : vector<8x128xf32>
    %267 = arith.subf %266, %253 : vector<8x128xf32>
    %268 = vector.broadcast %30 : vector<8x1xf32> to vector<8x128xf32>
    %269 = arith.addf %267, %268 : vector<8x128xf32>
    %270 = arith.mulf %103, %265 : vector<8x128xf32>
    %271 = arith.subf %270, %257 : vector<8x128xf32>
    %272 = vector.broadcast %27 : vector<8x1xf32> to vector<8x128xf32>
    %273 = arith.addf %271, %272 : vector<8x128xf32>
    %274 = arith.mulf %103, %269 : vector<8x128xf32>
    %275 = arith.subf %274, %261 : vector<8x128xf32>
    %276 = vector.broadcast %28 : vector<8x1xf32> to vector<8x128xf32>
    %277 = arith.addf %275, %276 : vector<8x128xf32>
    %278 = arith.mulf %103, %273 : vector<8x128xf32>
    %279 = arith.subf %278, %265 : vector<8x128xf32>
    %280 = vector.broadcast %25 : vector<8x1xf32> to vector<8x128xf32>
    %281 = arith.addf %279, %280 : vector<8x128xf32>
    %282 = arith.mulf %103, %277 : vector<8x128xf32>
    %283 = arith.subf %282, %269 : vector<8x128xf32>
    %284 = vector.broadcast %26 : vector<8x1xf32> to vector<8x128xf32>
    %285 = arith.addf %283, %284 : vector<8x128xf32>
    %286 = arith.mulf %103, %281 : vector<8x128xf32>
    %287 = arith.subf %286, %273 : vector<8x128xf32>
    %288 = vector.broadcast %23 : vector<8x1xf32> to vector<8x128xf32>
    %289 = arith.addf %287, %288 : vector<8x128xf32>
    %290 = arith.mulf %103, %285 : vector<8x128xf32>
    %291 = arith.subf %290, %277 : vector<8x128xf32>
    %292 = vector.broadcast %24 : vector<8x1xf32> to vector<8x128xf32>
    %293 = arith.addf %291, %292 : vector<8x128xf32>
    %294 = arith.mulf %103, %289 : vector<8x128xf32>
    %295 = arith.subf %294, %281 : vector<8x128xf32>
    %296 = vector.broadcast %21 : vector<8x1xf32> to vector<8x128xf32>
    %297 = arith.addf %295, %296 : vector<8x128xf32>
    %298 = arith.mulf %103, %293 : vector<8x128xf32>
    %299 = arith.subf %298, %285 : vector<8x128xf32>
    %300 = vector.broadcast %22 : vector<8x1xf32> to vector<8x128xf32>
    %301 = arith.addf %299, %300 : vector<8x128xf32>
    %302 = arith.mulf %103, %297 : vector<8x128xf32>
    %303 = arith.subf %302, %289 : vector<8x128xf32>
    %304 = vector.broadcast %19 : vector<8x1xf32> to vector<8x128xf32>
    %305 = arith.addf %303, %304 : vector<8x128xf32>
    %306 = arith.mulf %103, %301 : vector<8x128xf32>
    %307 = arith.subf %306, %293 : vector<8x128xf32>
    %308 = vector.broadcast %20 : vector<8x1xf32> to vector<8x128xf32>
    %309 = arith.addf %307, %308 : vector<8x128xf32>
    %310 = arith.mulf %103, %305 : vector<8x128xf32>
    %311 = arith.subf %310, %297 : vector<8x128xf32>
    %312 = vector.broadcast %17 : vector<8x1xf32> to vector<8x128xf32>
    %313 = arith.addf %311, %312 : vector<8x128xf32>
    %314 = arith.mulf %103, %309 : vector<8x128xf32>
    %315 = arith.subf %314, %301 : vector<8x128xf32>
    %316 = vector.broadcast %18 : vector<8x1xf32> to vector<8x128xf32>
    %317 = arith.addf %315, %316 : vector<8x128xf32>
    %318 = arith.mulf %103, %313 : vector<8x128xf32>
    %319 = arith.subf %318, %305 : vector<8x128xf32>
    %320 = vector.broadcast %15 : vector<8x1xf32> to vector<8x128xf32>
    %321 = arith.addf %319, %320 : vector<8x128xf32>
    %322 = arith.mulf %103, %317 : vector<8x128xf32>
    %323 = arith.subf %322, %309 : vector<8x128xf32>
    %324 = vector.broadcast %16 : vector<8x1xf32> to vector<8x128xf32>
    %325 = arith.addf %323, %324 : vector<8x128xf32>
    %326 = arith.mulf %103, %321 : vector<8x128xf32>
    %327 = arith.subf %326, %313 : vector<8x128xf32>
    %328 = vector.broadcast %13 : vector<8x1xf32> to vector<8x128xf32>
    %329 = arith.addf %327, %328 : vector<8x128xf32>
    %330 = arith.mulf %103, %325 : vector<8x128xf32>
    %331 = arith.subf %330, %317 : vector<8x128xf32>
    %332 = vector.broadcast %14 : vector<8x1xf32> to vector<8x128xf32>
    %333 = arith.addf %331, %332 : vector<8x128xf32>
    %334 = arith.mulf %103, %329 : vector<8x128xf32>
    %335 = arith.subf %334, %321 : vector<8x128xf32>
    %336 = vector.broadcast %11 : vector<8x1xf32> to vector<8x128xf32>
    %337 = arith.addf %335, %336 : vector<8x128xf32>
    %338 = arith.mulf %103, %333 : vector<8x128xf32>
    %339 = arith.subf %338, %325 : vector<8x128xf32>
    %340 = vector.broadcast %12 : vector<8x1xf32> to vector<8x128xf32>
    %341 = arith.addf %339, %340 : vector<8x128xf32>
    %342 = arith.mulf %103, %337 : vector<8x128xf32>
    %343 = arith.subf %342, %329 : vector<8x128xf32>
    %344 = vector.broadcast %9 : vector<8x1xf32> to vector<8x128xf32>
    %345 = arith.addf %343, %344 : vector<8x128xf32>
    %346 = arith.mulf %103, %341 : vector<8x128xf32>
    %347 = arith.subf %346, %333 : vector<8x128xf32>
    %348 = vector.broadcast %10 : vector<8x1xf32> to vector<8x128xf32>
    %349 = arith.addf %347, %348 : vector<8x128xf32>
    %350 = arith.mulf %103, %345 : vector<8x128xf32>
    %351 = arith.subf %350, %337 : vector<8x128xf32>
    %352 = vector.broadcast %7 : vector<8x1xf32> to vector<8x128xf32>
    %353 = arith.addf %351, %352 : vector<8x128xf32>
    %354 = arith.mulf %103, %349 : vector<8x128xf32>
    %355 = arith.subf %354, %341 : vector<8x128xf32>
    %356 = vector.broadcast %8 : vector<8x1xf32> to vector<8x128xf32>
    %357 = arith.addf %355, %356 : vector<8x128xf32>
    %358 = arith.mulf %99, %345 : vector<8x128xf32>
    %359 = arith.mulf %102, %349 : vector<8x128xf32>
    %360 = arith.addf %358, %359 : vector<8x128xf32>
    %361 = arith.subf %353, %360 : vector<8x128xf32>
    %362 = arith.mulf %99, %349 : vector<8x128xf32>
    %363 = arith.mulf %102, %345 : vector<8x128xf32>
    %364 = arith.subf %362, %363 : vector<8x128xf32>
    %365 = arith.subf %357, %364 : vector<8x128xf32>
    %366 = arith.mulf %99, %361 : vector<8x128xf32>
    %367 = arith.mulf %102, %365 : vector<8x128xf32>
    %368 = arith.subf %366, %367 : vector<8x128xf32>
    %c0_13 = arith.constant 0 : index
    %c0_14 = arith.constant 0 : index
    %369 = vector.load %arg7[%c0_13, %c0_14] : memref<8x128xf32, #tpu.memory_space<vmem>>, vector<8x128xf32>
    tpu.vector_store %arg7[%c0_13, %c0_14], %368 {strides = array<i32>} : memref<8x128xf32, #tpu.memory_space<vmem>>, vector<8x128xf32>,
    %370 = arith.mulf %99, %365 : vector<8x128xf32>
    %371 = arith.mulf %102, %361 : vector<8x128xf32>
    %372 = arith.addf %370, %371 : vector<8x128xf32>
    %c0_15 = arith.constant 0 : index
    %c0_16 = arith.constant 0 : index
    %373 = vector.load %arg8[%c0_15, %c0_16] : memref<8x128xf32, #tpu.memory_space<vmem>>, vector<8x128xf32>
    tpu.vector_store %arg8[%c0_15, %c0_16], %372 {strides = array<i32>} : memref<8x128xf32, #tpu.memory_space<vmem>>, vector<8x128xf32>,
    return
  }
  func.func @transform_0(%arg0: i32, %arg1: i32) -> (i32, i32) {
    %c0_i32 = arith.constant 0 : i32
    %c0_i32_0 = arith.constant 0 : i32
    return %arg0, %c0_i32 : i32, i32
  }
  func.func @transform_1(%arg0: i32, %arg1: i32) -> (i32, i32) {
    %c0_i32 = arith.constant 0 : i32
    %c0_i32_0 = arith.constant 0 : i32
    return %c0_i32, %arg1 : i32, i32
  }
  func.func @transform_2(%arg0: i32, %arg1: i32) -> (i32, i32) {
    %c0_i32 = arith.constant 0 : i32
    %c0_i32_0 = arith.constant 0 : i32
    return %c0_i32, %arg1 : i32, i32
  }
  func.func @transform_3(%arg0: i32, %arg1: i32) -> (i32, i32) {
    %c0_i32 = arith.constant 0 : i32
    %c0_i32_0 = arith.constant 0 : i32
    return %arg0, %c0_i32 : i32, i32
  }
  func.func @transform_4(%arg0: i32, %arg1: i32) -> (i32, i32) {
    %c0_i32 = arith.constant 0 : i32
    %c0_i32_0 = arith.constant 0 : i32
    return %arg0, %c0_i32 : i32, i32
  }
  func.func @transform_5(%arg0: i32, %arg1: i32) -> (i32, i32) {
    %c0_i32 = arith.constant 0 : i32
    return %arg0, %arg1 : i32, i32
  }
  func.func @transform_6(%arg0: i32, %arg1: i32) -> (i32, i32) {
    %c0_i32 = arith.constant 0 : i32
    return %arg0, %arg1 : i32, i32
  }
}

</mosaic_0001>

<bundles_post_ra>
// kernel: tpu_custom_call.1
= control target key start
LH: loop header
LB: loop body
LE: loop exit
PB: predicated region body
PF: predicated region fallthrough
CT: control target
= control target key end

     0   :  { %s1903_s0 = inlined_call_operand.vmem [shape: f32[8,1], index: 0, kind: input, shape index: {}]   ;;  %s1904_s1 = inlined_call_operand.vmem [shape: f32[1,256], index: 1, kind: input, shape index: {}]   ;;  %s1905_s2 = inlined_call_operand.hbm [shape: f32[1,256], index: 2, kind: input, shape index: {}]   ;;  %s1906_s3 = inlined_call_operand.vmem [shape: f32[8,32], index: 3, kind: input, shape index: {}]   ;;  %s1907_s4 = inlined_call_operand.hbm [shape: f32[8,32], index: 4, kind: input, shape index: {}]   ;;  %s1908_s5 = inlined_call_operand.hbm [shape: f32[8,256], index: 5, kind: output, shape index: {0}]   ;;  %s1909_s6 = inlined_call_operand.hbm [shape: f32[8,256], index: 6, kind: output, shape index: {1}]  }
   0x1   :  { %1910 = sst [smem:[#allocation14_spill]] %s1903_s0 }
   0x2   :  { %12 = vsyncpa [#allocation3], 0 }
   0x3   :  { %14 = vsyncpa [#allocation3 + $0x1], 0 }
   0x4   :  { %15 = vsyncpa [#allocation6], 0 }
   0x5   :  { %16 = vsyncpa [#allocation4], 0 }
   0x6   :  { %18 = vsyncpa [#allocation4 + $0x1], 0 }
   0x7   :  { %19 = vsyncpa [#allocation9], 0 }
   0x8   :  { %21 = vsyncpa [#allocation9 + $0x1], 0  ;;  %s1517_s21 = smov 0   ;;  %s1519_s22 = smov 0  }
   0x9   :  { %s1521_s23 = smov 0   ;;  %s1523_s24 = smov 0  }
   0xa   :  { %s1525_s25 = smov 0   ;;  %s1527_s26 = smov 0  }
   0xb LB: > { %s1073_s27 = sadd.s32 4294967295, %s1447_s26   ;;  %s1074_s28 = sadd.s32 4294967294, %s1447_s26   ;;  %s1447_s26 = sphi %s1527_s26, %s27_s26   ;;  %s1443_s25 = sphi %s1525_s25, %s1923_s25   ;;  %s1439_s24 = sphi %s1523_s24, %s1922_s24   ;;  %s1435_s23 = sphi %s1521_s23, %s1921_s23   ;;  %s1431_s22 = sphi %s1519_s22, %s1920_s22   ;;  %s1427_s21 = sphi %s1517_s21, %s1919_s21  }
   0xc   : > { %p111_p0 = scmp.ne.s32.totalorder %s1431_s22, %s1427_s21  ;;  %p1551_p1 = scmp.eq.s32.totalorder %s1073_s27, 0 }
   0xd   : > { %p1555_p2 = scmp.eq.s32.totalorder %s1073_s27, 1  ;;  %p195_p3 = scmp.eq.s32.totalorder %s1074_s28, 1 }
   0xe   : > { %p1561_p4 = por %p1551_p1, %p111_p0  ;;  %p1075_p5 = scmp.ge.s32.totalorder %s1447_s26, 1 }
   0xf   : > { %p1566_p6 = por %p195_p3, %p111_p0  ;;  %p230_p7 = scmp.lt.s32.totalorder %s1447_s26, 3 }
  0x10   : > { %s258_s11 = sshll.u32 %s1907_s4, 4  ;;  %p1079_p9 = scmp.ge.s32.totalorder %s1447_s26, 2  ;;  %s259_s11 = int_to_ptr.hbm [resolvable:$true] %s258_s11 }
  0x11   : > { %p1574_p8 = pnand %p1075_p5, %p230_p7  ;;  %s1449_s13 = smov [#allocation5]  }
  0x12   : > { %s260_s14 = sshll.u32 %s1449_s13, 4  ;;  %s36_s15 = sadd.s32 1, %s1443_s25  ;;  %s261_s14 = int_to_ptr.vmem [resolvable:$true] %s260_s14 }
  0x13   : > { %p1101_p10 = pneg %p1574_p8  ;;  %p37_p12 = scmp.ge.s32.totalorder %s36_s15, 2 }
  0x14   : > { %s98_s16 = sadd.s32 1, %s1435_s23  ;;  %p105_p13 = scmp.ne.s32.totalorder %s1435_s23, %s1431_s22 }
  0x15   : > { %p1102_p11 = pnand %p1101_p10, %p1551_p1  ;;  %p106_p0 = scmp.eq.s32.totalorder %s1447_s26, 0 }
  0x16   : > { %s1925_s15 = smov (%p37_p12, %s36_s15), 0  ;;  %p1596_p5 = por %p1555_p2, %p105_p13 }
  0x17   : > { %1104 = dma.hbm_to_vmem [thread:$0]  (!%p1102_p11), %s259_s11, 128, %s261_s14, [#allocation6]  }
  0x18   : > { %p1590_p3 = por %p106_p0, %p105_p13  ;;  %s95_s19 = ssub.s32 %s1443_s25, %s1925_s15 }
  0x19   : > { %p1117_p7 = scmp.lt.s32.totalorder %s1447_s26, 2  ;;  %p96_p10 = scmp.eq.s32.totalorder %s95_s19, 0 }
  0x1a   : > { %s277_s20 = sand.u32 1, %s1435_s23   ;;  %s283_s10 = scalar_lea.hbm %s1905_s2, %s1443_s25 }
  0x1b   : > { %s1605_s27 = scalar_select %p96_p10, %s1435_s23, %s98_s16  }
  0x1c   : > { %s280_s11 = scalar_lea.vmem [#allocation2], %s277_s20  ;;  %s285_s14 = sshll.u32 %s283_s10, 4  ;;  %s286_s14 = int_to_ptr.hbm [resolvable:$true] %s285_s14 }
  0x1d   : > { %s287_s13 = sshll.u32 %s280_s11, 4  ;;  %p1106_p2 = pnand %p1117_p7, %p1590_p3  ;;  %s288_s13 = int_to_ptr.vmem [resolvable:$true] %s287_s13 }
  0x1e   : > { %s278_s30 = scalar_lea.sflag [#allocation3], %s277_s20  ;;  %296 = sbr.rel (%p1574_p8) target bundleno = 411 (0x19b), region = 40 }
  0x1f   : > { %1108 = dma.hbm_to_vmem [thread:$0]  (!%p1106_p2), %s286_s14, 16, %s288_s13, %s278_s30  }
  0x20   : > { %s1616_s16 = sand.u32 (!%p1574_p8), 1, %s1431_s22  }
  0x21   : > { %s299_s19 = scalar_lea.sflag (!%p1574_p8), [#allocation3], %s1616_s16  ;;  %s301_s28 = scalar_lea.vmem (!%p1574_p8), [#allocation2], %s1616_s16 }
  0x23   : > { %1410 = dma.done.wait (%p1561_p4), %s299_s19, 16  }
  0x24   : > { %1412 = vsyncadd (%p1561_p4), %s299_s19, 4294967280 }
  0x25   : > { %1414 = dma.done.wait (%p1551_p1), [#allocation6], 128  }
  0x26   : > { %1416 = vsyncadd (%p1551_p1), [#allocation6], 4294967168  ;;  %v1450_v0 = vmov 31   ;;  %v1451_v1 = vmov 0   ;;  %p355_p8 = scmp.lt.s32.totalorder %s1439_s24, 1  ;;  %v1452_v2 = vmov 30  }
  0x27   : > { %1202 = vset.pattern.permute.xlu1 %v1450_v0  ;;  %1201 = vset.pattern.permute.xlu0 %v1451_v1  ;;  %v1636_v3 = vld [vmem:[%s1906_s3] sm:$0xff]  ;;  %s1918_s0 = sld [smem:[#allocation14_spill]]  ;;  %v1453_v8 = vmov 29   ;;  %v1454_v9 = vmov 28   ;;  %v1455_v10 = vmov 27   ;;  %v1456_v11 = vmov 26  }
  0x28   : > { %1203 = vset.pattern.permute.xlu2 %v1452_v2  ;;  %s1631_s12 = scalar_select %p355_p8, %s1439_s24, 1  ;;  %416 = vperm.xlu1 %1202, %v1636_v3   ;;  %v1647_v6 = vld [vmem:[#allocation5] sm:$0xff]  ;;  %v1457_v12 = vmov 24   ;;  %v1458_v13 = vmov 25   ;;  %v1459_v14 = vmov 22   ;;  %v1460_v15 = vmov 23  }
  0x29   : > { %426 = vperm.xlu2 %1203, %v1636_v3   ;;  %v1461_v16 = vmov 19   ;;  %v1462_v17 = vmov 21   ;;  %v1463_v18 = vmov 20   ;;  %v1464_v19 = vmov 18   ;;  %v1266_v32 = vld [vmem:[%s301_s28] ss:$0 sm:$0xff] }
  0x2a   : > { %s357_s11 = scalar_lea.vmem %s1904_s1, %s1631_s12  ;;  %v1465_v21 = vmov 17   ;;  %v1466_v22 = vmov 14   ;;  %v1467_v24 = vmov 16   ;;  %v1468_v27 = vmov 15   ;;  %s1082_s30 = sshll.u32 %s1616_s16, 3 }
  0x2b   : > { %v1265_v29 = vld [vmem:[%s357_s11] ss:$0 sm:$0xff]  ;;  %v1469_v31 = vmov 12   ;;  %v1470_v36 = vmov 13   ;;  %v1471_v47 = vmov 9   ;;  %v1472_v56 = vmov 11  }
  0x2c   : > { %v1473_v0 = vmov 10   ;;  %s1087_s19 = sshll.u32 %s1439_s24, 3  ;;  %s343_s9 = scalar_lea.vmem [#allocation7], %s1082_s30 }
  0x2d   : > { %v362_v4 = vld [vmem:[%s1918_s0] sm:$0xff]  ;;  %s890_s7 = scalar_lea.hbm %s1908_s5, %s1087_s19  ;;  %s906_s20 = scalar_lea.hbm %s1909_s6, %s1087_s19 }
  0x2e   : > { %v363_v5 = vadd.f32 1.0, %v362_v4  ;;  %v1084_v7 = vadd.f32 -1.0, %v362_v4  ;;  %v1474_v4 = vmov 7   ;;  %s892_s10 = sshll.u32 %s343_s9, 4  ;;  %s894_s24 = sshll.u32 %s890_s7, 4  ;;  %s893_s10 = int_to_ptr.vmem [resolvable:$true] %s892_s10  ;;  %s895_s24 = int_to_ptr.hbm [resolvable:$true] %s894_s24 }
  0x2f   : > { %s350_s11 = scalar_lea.vmem [#allocation8], %s1082_s30  ;;  %s910_s14 = sshll.u32 %s906_s20, 4  ;;  %s1853_s14 = int_to_ptr.hbm [resolvable:$true] %s910_s14 }
  0x30   : > { %371 = vperm.xlu0 %1201, %v363_v5   ;;  %421 = vperm.xlu1 %1202, %v1647_v6   ;;  %s908_s13 = sshll.u32 %s350_s11, 4  ;;  %s873_s19 = scalar_lea.sflag [#allocation4], %s1616_s16  ;;  %s1851_s13 = int_to_ptr.vmem [resolvable:$true] %s908_s13 }
  0x31   : > { %432 = vperm.xlu2 %1203, %v1647_v6   ;;  %s1343_s28 = sshra.s32 %s895_s24, 4  ;;  %s1349_s17 = scalar_lea.hbm %s1908_s5, 16  ;;  %s1344_s28 = int_to_ptr.hbm [resolvable:$true] %s1343_s28 }
  0x32   : > { %s1345_s12 = scalar_lea.hbm %s1344_s28, 8  ;;  %p1350_p12 = scmp.lt.s32.totalorder %s1344_s28, %s1908_s5 }
  0x33   : > { %p1346_p1 = scmp.ne.s32.totalorder %s1344_s28, %s1345_s12  ;;  %p1351_p13 = scmp.lt.s32.totalorder %s1349_s17, %s1345_s12 }
  0x35   : > { %p1347_p4 = pnand %p1346_p1, %p1596_p5  ;;  %p1352_p0 = por %p1351_p13, %p1350_p12 }
  0x37   : > { %p1348_p11 = pneg %p1347_p4 }
  0x38   : > { %380 = vperm.xlu0 %1201, %v1084_v7   ;;  %1205 = vset.pattern.permute.xlu1 %v1453_v8 }
  0x39   : > { %1206 = vset.pattern.permute.xlu2 %v1454_v9  ;;  %446 = vperm.xlu1 %1205, %v1647_v6   ;;  %p1353_p3 = pnand %p1352_p0, %p1348_p11 }
  0x3a   : > { %453 = vperm.xlu2 %1206, %v1636_v3  }
  0x40   : > { %1204 = vset.pattern.permute.xlu0 %v1453_v8 }
  0x41   : > { %439 = vperm.xlu0 %1204, %v1636_v3   ;;  %1207 = vset.pattern.permute.xlu1 %v1454_v9 }
  0x42   : > { %1208 = vset.pattern.permute.xlu2 %v1455_v10  ;;  %460 = vperm.xlu1 %1207, %v1647_v6  }
  0x43   : > { %467 = vperm.xlu2 %1208, %v1636_v3  }
  0x49   : > { %1209 = vset.pattern.permute.xlu0 %v1455_v10 }
  0x4a   : > { %474 = vperm.xlu0 %1209, %v1647_v6   ;;  %1210 = vset.pattern.permute.xlu1 %v1456_v11 }
  0x4b   : > { %1211 = vset.pattern.permute.xlu2 %v1456_v11  ;;  %481 = vperm.xlu1 %1210, %v1636_v3  }
  0x4c   : > { %488 = vperm.xlu2 %1211, %v1647_v6  }
  0x52   : > { %1214 = vset.pattern.permute.xlu0 %v1457_v12 }
  0x53   : > { %509 = vperm.xlu0 %1214, %v1636_v3   ;;  %1212 = vset.pattern.permute.xlu1 %v1458_v13 }
  0x54   : > { %1213 = vset.pattern.permute.xlu2 %v1458_v13  ;;  %495 = vperm.xlu1 %1212, %v1636_v3  }
  0x55   : > { %502 = vperm.xlu2 %1213, %v1647_v6  }
  0x5b   : > { %1219 = vset.pattern.permute.xlu0 %v1459_v14 }
  0x5c   : > { %544 = vperm.xlu0 %1219, %v1647_v6   ;;  %1215 = vset.pattern.permute.xlu1 %v1457_v12 }
  0x5d   : > { %1216 = vset.pattern.permute.xlu2 %v1460_v15  ;;  %516 = vperm.xlu1 %1215, %v1647_v6  }
  0x5e   : > { %523 = vperm.xlu2 %1216, %v1636_v3  }
  0x64   : > { %1224 = vset.pattern.permute.xlu0 %v1461_v16 }
  0x65   : > { %579 = vperm.xlu0 %1224, %v1636_v3   ;;  %1217 = vset.pattern.permute.xlu1 %v1460_v15 }
  0x66   : > { %1218 = vset.pattern.permute.xlu2 %v1459_v14  ;;  %530 = vperm.xlu1 %1217, %v1647_v6   ;;  %v1475_v14 = vmov 8  }
  0x67   : > { %537 = vperm.xlu2 %1218, %v1636_v3  }
  0x6d   : > { %1229 = vset.pattern.permute.xlu0 %v1465_v21 }
  0x6e   : > { %1220 = vset.pattern.permute.xlu1 %v1462_v17  ;;  %614 = vperm.xlu0 %1229, %v1647_v6  }
  0x6f   : > { %1221 = vset.pattern.permute.xlu2 %v1462_v17  ;;  %551 = vperm.xlu1 %1220, %v1636_v3  }
  0x70   : > { %558 = vperm.xlu2 %1221, %v1647_v6  }
  0x76   : > { %1234 = vset.pattern.permute.xlu0 %v1466_v22 }
  0x77   : > { %1222 = vset.pattern.permute.xlu1 %v1463_v18  ;;  %649 = vperm.xlu0 %1234, %v1636_v3  }
  0x78   : > { %1223 = vset.pattern.permute.xlu2 %v1463_v18  ;;  %565 = vperm.xlu1 %1222, %v1636_v3  }
  0x79   : > { %572 = vperm.xlu2 %1223, %v1647_v6  }
  0x7f   : > { %1239 = vset.pattern.permute.xlu0 %v1469_v31 }
  0x80   : > { %1225 = vset.pattern.permute.xlu1 %v1461_v16  ;;  %684 = vperm.xlu0 %1239, %v1647_v6  }
  0x81   : > { %1226 = vset.pattern.permute.xlu2 %v1464_v19  ;;  %586 = vperm.xlu1 %1225, %v1647_v6  }
  0x82   : > { %593 = vperm.xlu2 %1226, %v1636_v3  }
  0x83   : > { %v1674_v20 = vpop.permute.xlu2 %426 }
  0x88   : > { %1244 = vset.pattern.permute.xlu0 %v1471_v47 }
  0x89   : > { %1227 = vset.pattern.permute.xlu1 %v1464_v19  ;;  %719 = vperm.xlu0 %1244, %v1636_v3  }
  0x8a   : > { %1228 = vset.pattern.permute.xlu2 %v1465_v21  ;;  %600 = vperm.xlu1 %1227, %v1647_v6  }
  0x8b   : > { %607 = vperm.xlu2 %1228, %v1636_v3   ;;  %v1679_v23 = vpop.permute.xlu2 %432 }
  0x91   : > { %1249 = vset.pattern.permute.xlu0 %v1474_v4 }
  0x92   : > { %1230 = vset.pattern.permute.xlu1 %v1467_v24  ;;  %754 = vperm.xlu0 %1249, %v1647_v6  }
  0x93   : > { %1231 = vset.pattern.permute.xlu2 %v1467_v24  ;;  %621 = vperm.xlu1 %1230, %v1636_v3   ;;  %v1476_v24 = vmov 4  }
  0x94   : > { %628 = vperm.xlu2 %1231, %v1647_v6   ;;  %v1684_v25 = vpop.permute.xlu2 %453 }
  0x9a   : > { %v1686_v26 = vpop.permute.xlu1 %416  ;;  %1254 = vset.pattern.permute.xlu0 %v1476_v24 }
  0x9b   : > { %1232 = vset.pattern.permute.xlu1 %v1468_v27  ;;  %789 = vperm.xlu0 %1254, %v1636_v3  }
  0x9c   : > { %1233 = vset.pattern.permute.xlu2 %v1468_v27  ;;  %635 = vperm.xlu1 %1232, %v1636_v3  }
  0x9d   : > { %642 = vperm.xlu2 %1233, %v1647_v6   ;;  %v1695_v30 = vpop.permute.xlu2 %467 }
  0xa2   : > { %v372_v28 = vpop.permute.xlu0 %371  ;;  %v1700_v34 = vpop.permute.xlu1 %421 }
  0xa3   : > { %v377_v33 = vmul.f32 %v1265_v29, %v372_v28  ;;  %v387_v40 = vmul.f32 %v1266_v32, %v372_v28 }
  0xa4   : > { %1235 = vset.pattern.permute.xlu1 %v1466_v22 }
  0xa5   : > { %1236 = vset.pattern.permute.xlu2 %v1470_v36  ;;  %656 = vperm.xlu1 %1235, %v1647_v6  }
  0xa6   : > { %663 = vperm.xlu2 %1236, %v1636_v3   ;;  %v1704_v46 = vpop.permute.xlu2 %488 }
  0xaa   : > { %v381_v35 = vpop.permute.xlu0 %380 }
  0xab   : > { %v383_v37 = vadd.f32 %v381_v35, %v377_v33  ;;  %v388_v38 = vmul.f32 %v1265_v29, %v381_v35  ;;  %v390_v39 = vmul.f32 %v1266_v32, %v381_v35  ;;  %v447_v50 = vpop.permute.xlu1 %446 }
  0xad   : > { %v389_v41 = vadd.f32 %v388_v38, %v372_v28  ;;  %v392_v42 = vmul.f32 %v390_v39, %v387_v40  ;;  %v395_v45 = vmul.f32 %v390_v39, %v383_v37  ;;  %1237 = vset.pattern.permute.xlu1 %v1470_v36 }
  0xae   : > { %1238 = vset.pattern.permute.xlu2 %v1469_v31  ;;  %670 = vperm.xlu1 %1237, %v1647_v6  }
  0xaf   : > { %v391_v43 = vmul.f32 %v389_v41, %v383_v37  ;;  %v394_v44 = vmul.f32 %v389_v41, %v387_v40  ;;  %677 = vperm.xlu2 %1238, %v1636_v3   ;;  %v1709_v54 = vpop.permute.xlu2 %502  ;;  %v1477_v41 = vmov 6  }
  0xb1   : > { %v393_v48 = vadd.f32 %v392_v42, %v391_v43  ;;  %v396_v49 = vsub.f32 %v394_v44, %v395_v45 }
  0xb3   : > { %v397_v51 = vmul.f32 %v393_v48, %v393_v48  ;;  %v398_v52 = vmul.f32 %v396_v49, %v396_v49  ;;  %v440_v19 = vpop.permute.xlu0 %439 }
  0xb4   : > { %v461_v55 = vpop.permute.xlu1 %460 }
  0xb5   : > { %v399_v53 = vadd.f32 %v398_v52, %v397_v51 }
  0xb6   : > { %1240 = vset.pattern.permute.xlu1 %v1472_v56 }
  0xb7   : > { %1267 = vrsqrt.f32 %v399_v53  ;;  %1241 = vset.pattern.permute.xlu2 %v1472_v56  ;;  %691 = vperm.xlu1 %1240, %v1636_v3   ;;  %vm406_vm1 = vweird.f32 %v399_v53 }
  0xb8   : > { %698 = vperm.xlu2 %1241, %v1647_v6   ;;  %v1715_v62 = vpop.permute.xlu2 %523 }
  0xbc   : > { %v475_v38 = vpop.permute.xlu0 %474 }
  0xbd   : > { %v1268_v57 = vpop.eup %1267  ;;  %v1713_v61 = vpop.permute.xlu1 %481 }
  0xbe   : > { %v401_v58 = vmul.f32 %v1268_v57, %v399_v53  ;;  %vm407_vm0 = vweird.f32 %v1268_v57  ;;  %v1479_v53 = vmov 5  }
  0xbf   : > { %1242 = vset.pattern.permute.xlu1 %v1473_v0  ;;  %vm408_vm2 = vmor %vm406_vm1, %vm407_vm0 }
  0xc0   : > { %v402_v59 = vmul.f32 %v1268_v57, %v401_v58  ;;  %1243 = vset.pattern.permute.xlu2 %v1473_v0  ;;  %705 = vperm.xlu1 %1242, %v1636_v3  }
  0xc1   : > { %712 = vperm.xlu2 %1243, %v1647_v6   ;;  %v1734_v13 = vpop.permute.xlu2 %537 }
  0xc2   : > { %v403_v60 = vmul.f32 0.5, %v402_v59 }
  0xc4   : > { %v404_v63 = vsub.f32 1.5, %v403_v60 }
  0xc5   : > { %v510_v0 = vpop.permute.xlu0 %509 }
  0xc6   : > { %v405_v2 = vmul.f32 %v1268_v57, %v404_v63  ;;  %v1728_v10 = vpop.permute.xlu1 %495 }
  0xc8   : > { %v409_v5 = vsel %vm408_vm2, %v1268_v57, %v405_v2  ;;  %1245 = vset.pattern.permute.xlu1 %v1471_v47  ;;  %v1478_v47 = vmov 2  }
  0xc9   : > { %v1720_v7 = vmul.f32 %v409_v5, %v393_v48  ;;  %v1722_v8 = vmul.f32 %v409_v5, %v396_v49  ;;  %1246 = vset.pattern.permute.xlu2 %v1475_v14  ;;  %726 = vperm.xlu1 %1245, %v1647_v6   ;;  %v1480_v5 = vmov 3  }
  0xca   : > { %733 = vperm.xlu2 %1246, %v1636_v3   ;;  %v1747_v31 = vpop.permute.xlu2 %558  ;;  %1259 = vset.pattern.permute.xlu0 %v1478_v47 }
  0xcb   : > { %v1726_v9 = vadd.f32 %v1720_v7, %v1720_v7  ;;  %824 = vperm.xlu0 %1259, %v1647_v6  }
  0xcd   : > { %v424_v11 = vmul.f32 %v1686_v26, %v1726_v9  ;;  %v430_v12 = vmul.f32 %v1700_v34, %v1726_v9 }
  0xcf   : > { %v429_v15 = vadd.f32 %v1674_v20, %v424_v11  ;;  %v435_v16 = vadd.f32 %v1679_v23, %v430_v12  ;;  %v517_v20 = vpop.permute.xlu1 %516 }
  0xd1   : > { %v436_v17 = vmul.f32 %v429_v15, %v1726_v9  ;;  %v443_v18 = vmul.f32 %v435_v16, %v1726_v9  ;;  %1247 = vset.pattern.permute.xlu1 %v1475_v14 }
  0xd2   : > { %1248 = vset.pattern.permute.xlu2 %v1474_v4  ;;  %740 = vperm.xlu1 %1247, %v1647_v6  }
  0xd3   : > { %v437_v21 = vsub.f32 %v436_v17, %v1686_v26  ;;  %v444_v22 = vsub.f32 %v443_v18, %v1700_v34  ;;  %747 = vperm.xlu2 %1248, %v1636_v3   ;;  %v1756_v44 = vpop.permute.xlu2 %572  ;;  %1264 = vset.pattern.permute.xlu0 %v1451_v1 }
  0xd5   : > { %v449_v27 = vadd.f32 %v447_v50, %v444_v22  ;;  %v442_v28 = vadd.f32 %v440_v19, %v437_v21 }
  0xd7   : > { %v457_v23 = vmul.f32 %v449_v27, %v1726_v9  ;;  %v450_v29 = vmul.f32 %v442_v28, %v1726_v9 }
  0xd8   : > { %v531_v37 = vpop.permute.xlu1 %530 }
  0xd9   : > { %v458_v26 = vsub.f32 %v457_v23, %v435_v16  ;;  %v451_v32 = vsub.f32 %v450_v29, %v429_v15 }
  0xda   : > { %1250 = vset.pattern.permute.xlu1 %v1477_v41 }
  0xdb   : > { %v463_v33 = vadd.f32 %v461_v55, %v458_v26  ;;  %v456_v34 = vadd.f32 %v1684_v25, %v451_v32  ;;  %1251 = vset.pattern.permute.xlu2 %v1477_v41  ;;  %761 = vperm.xlu1 %1250, %v1636_v3  }
  0xdc   : > { %768 = vperm.xlu2 %1251, %v1647_v6   ;;  %v1768_v58 = vpop.permute.xlu2 %593 }
  0xdd   : > { %v471_v35 = vmul.f32 %v463_v33, %v1726_v9  ;;  %v464_v36 = vmul.f32 %v456_v34, %v1726_v9 }
  0xdf   : > { %v472_v39 = vsub.f32 %v471_v35, %v449_v27  ;;  %v465_v40 = vsub.f32 %v464_v36, %v442_v28  ;;  %v1481_v35 = vmov 1  }
  0xe1   : > { %v470_v42 = vadd.f32 %v1695_v30, %v465_v40  ;;  %v477_v43 = vadd.f32 %v475_v38, %v472_v39  ;;  %v552_v30 = vpop.permute.xlu1 %551 }
  0xe3   : > { %v478_v25 = vmul.f32 %v470_v42, %v1726_v9  ;;  %v485_v45 = vmul.f32 %v477_v43, %v1726_v9  ;;  %1252 = vset.pattern.permute.xlu1 %v1479_v53 }
  0xe4   : > { %1253 = vset.pattern.permute.xlu2 %v1479_v53  ;;  %775 = vperm.xlu1 %1252, %v1636_v3  }
  0xe5   : > { %v486_v48 = vsub.f32 %v485_v45, %v463_v33  ;;  %v479_v49 = vsub.f32 %v478_v25, %v456_v34  ;;  %782 = vperm.xlu2 %1253, %v1647_v6   ;;  %v608_v14 = vpop.permute.xlu2 %607 }
  0xe7   : > { %v491_v50 = vadd.f32 %v1704_v46, %v486_v48  ;;  %v484_v51 = vadd.f32 %v1713_v61, %v479_v49 }
  0xe9   : > { %v499_v52 = vmul.f32 %v491_v50, %v1726_v9  ;;  %v492_v55 = vmul.f32 %v484_v51, %v1726_v9 }
  0xea   : > { %v566_v63 = vpop.permute.xlu1 %565 }
  0xeb   : > { %v500_v56 = vsub.f32 %v499_v52, %v477_v43  ;;  %v493_v57 = vsub.f32 %v492_v55, %v470_v42 }
  0xec   : > { %1255 = vset.pattern.permute.xlu1 %v1476_v24  ;;  %v545_v24 = vpop.permute.xlu0 %544 }
  0xed   : > { %v505_v46 = vadd.f32 %v1709_v54, %v500_v56  ;;  %v498_v59 = vadd.f32 %v1728_v10, %v493_v57  ;;  %1256 = vset.pattern.permute.xlu2 %v1480_v5  ;;  %796 = vperm.xlu1 %1255, %v1647_v6  }
  0xee   : > { %803 = vperm.xlu2 %1256, %v1636_v3   ;;  %v629_v29 = vpop.permute.xlu2 %628 }
  0xef   : > { %v513_v60 = vmul.f32 %v505_v46, %v1726_v9  ;;  %v506_v61 = vmul.f32 %v498_v59, %v1726_v9 }
  0xf1   : > { %v514_v2 = vsub.f32 %v513_v60, %v491_v50  ;;  %v507_v4 = vsub.f32 %v506_v61, %v484_v51 }
  0xf3   : > { %v519_v11 = vadd.f32 %v517_v20, %v514_v2  ;;  %v512_v12 = vadd.f32 %v510_v0, %v507_v4  ;;  %v587_v19 = vpop.permute.xlu1 %586 }
  0xf5   : > { %v527_v54 = vmul.f32 %v519_v11, %v1726_v9  ;;  %v520_v10 = vmul.f32 %v512_v12, %v1726_v9  ;;  %1257 = vset.pattern.permute.xlu1 %v1480_v5 }
  0xf6   : > { %1258 = vset.pattern.permute.xlu2 %v1478_v47  ;;  %810 = vperm.xlu1 %1257, %v1647_v6   ;;  %v580_v47 = vpop.permute.xlu0 %579 }
  0xf7   : > { %v528_v15 = vsub.f32 %v527_v54, %v505_v46  ;;  %v521_v16 = vsub.f32 %v520_v10, %v498_v59  ;;  %817 = vperm.xlu2 %1258, %v1636_v3   ;;  %v643_v41 = vpop.permute.xlu2 %642 }
  0xf9   : > { %v533_v17 = vadd.f32 %v531_v37, %v528_v15  ;;  %v526_v18 = vadd.f32 %v1715_v62, %v521_v16 }
  0xfb   : > { %v541_v21 = vmul.f32 %v533_v17, %v1726_v9  ;;  %v534_v22 = vmul.f32 %v526_v18, %v1726_v9 }
  0xfc   : > { %v601_v32 = vpop.permute.xlu1 %600 }
  0xfd   : > { %v535_v27 = vsub.f32 %v534_v22, %v512_v12  ;;  %v542_v28 = vsub.f32 %v541_v21, %v519_v11 }
  0xfe   : > { %1260 = vset.pattern.permute.xlu1 %v1481_v35 }
  0xff   : > { %v540_v20 = vadd.f32 %v1734_v13, %v535_v27  ;;  %v547_v23 = vadd.f32 %v545_v24, %v542_v28  ;;  %1261 = vset.pattern.permute.xlu2 %v1481_v35  ;;  %831 = vperm.xlu1 %1260, %v1636_v3  }
 0x100   : > { %838 = vperm.xlu2 %1261, %v1647_v6   ;;  %v664_v52 = vpop.permute.xlu2 %663 }
 0x101   : > { %v548_v62 = vmul.f32 %v540_v20, %v1726_v9  ;;  %v555_v26 = vmul.f32 %v547_v23, %v1726_v9 }
 0x103   : > { %v556_v33 = vsub.f32 %v555_v26, %v533_v17  ;;  %v549_v34 = vsub.f32 %v548_v62, %v526_v18 }
 0x105   : > { %v561_v36 = vadd.f32 %v1747_v31, %v556_v33  ;;  %v554_v37 = vadd.f32 %v552_v30, %v549_v34  ;;  %v622_v43 = vpop.permute.xlu1 %621 }
 0x107   : > { %v569_v13 = vmul.f32 %v561_v36, %v1726_v9  ;;  %v562_v38 = vmul.f32 %v554_v37, %v1726_v9  ;;  %1262 = vset.pattern.permute.xlu1 %v1451_v1 }
 0x108   : > { %1263 = vset.pattern.permute.xlu2 %v1451_v1  ;;  %845 = vperm.xlu1 %1262, %v1636_v3  }
 0x109   : > { %v570_v39 = vsub.f32 %v569_v13, %v547_v23  ;;  %v563_v40 = vsub.f32 %v562_v38, %v540_v20  ;;  %852 = vperm.xlu2 %1263, %v1647_v6   ;;  %v615_v6 = vpop.permute.xlu0 %614  ;;  %v678_v2 = vpop.permute.xlu2 %677 }
 0x10b   : > { %v575_v42 = vadd.f32 %v1756_v44, %v570_v39  ;;  %v568_v25 = vadd.f32 %v566_v63, %v563_v40 }
 0x10d   : > { %v583_v45 = vmul.f32 %v575_v42, %v1726_v9  ;;  %v576_v31 = vmul.f32 %v568_v25, %v1726_v9 }
 0x10e   : > { %v636_v53 = vpop.permute.xlu1 %635 }
 0x10f   : > { %v584_v48 = vsub.f32 %v583_v45, %v561_v36  ;;  %v577_v49 = vsub.f32 %v576_v31, %v554_v37 }
 0x111   : > { %v589_v50 = vadd.f32 %v587_v19, %v584_v48  ;;  %v582_v30 = vadd.f32 %v580_v47, %v577_v49  ;;  %v650_v27 = vpop.permute.xlu0 %649 }
 0x112   : > { %v699_v19 = vpop.permute.xlu2 %698 }
 0x113   : > { %v597_v44 = vmul.f32 %v589_v50, %v1726_v9  ;;  %v590_v51 = vmul.f32 %v582_v30, %v1726_v9 }
 0x115   : > { %v598_v55 = vsub.f32 %v597_v44, %v575_v42  ;;  %v591_v56 = vsub.f32 %v590_v51, %v568_v25 }
 0x117   : > { %v603_v57 = vadd.f32 %v601_v32, %v598_v55  ;;  %v596_v1 = vadd.f32 %v1768_v58, %v591_v56  ;;  %v657_v0 = vpop.permute.xlu1 %656 }
 0x119   : > { %v611_v3 = vmul.f32 %v603_v57, %v1726_v9  ;;  %v604_v46 = vmul.f32 %v596_v1, %v1726_v9  ;;  %v685_v40 = vpop.permute.xlu0 %684 }
 0x11b   : > { %v605_v59 = vsub.f32 %v604_v46, %v582_v30  ;;  %v612_v60 = vsub.f32 %v611_v3, %v589_v50  ;;  %v713_v33 = vpop.permute.xlu2 %712 }
 0x11d   : > { %v610_v61 = vadd.f32 %v608_v14, %v605_v59  ;;  %v617_v63 = vadd.f32 %v615_v6, %v612_v60 }
 0x11f   : > { %v618_v4 = vmul.f32 %v610_v61, %v1726_v9  ;;  %v625_v5 = vmul.f32 %v617_v63, %v1726_v9 }
 0x120   : > { %v671_v16 = vpop.permute.xlu1 %670 }
 0x121   : > { %v619_v11 = vsub.f32 %v618_v4, %v596_v1  ;;  %v626_v12 = vsub.f32 %v625_v5, %v603_v57  ;;  %v720_v59 = vpop.permute.xlu0 %719 }
 0x123   : > { %v624_v54 = vadd.f32 %v622_v43, %v619_v11  ;;  %v631_v10 = vadd.f32 %v629_v29, %v626_v12 }
 0x124   : > { %v734_v45 = vpop.permute.xlu2 %733 }
 0x125   : > { %v632_v58 = vmul.f32 %v624_v54, %v1726_v9  ;;  %v639_v15 = vmul.f32 %v631_v10, %v1726_v9 }
 0x127   : > { %v633_v17 = vsub.f32 %v632_v58, %v610_v61  ;;  %v640_v18 = vsub.f32 %v639_v15, %v617_v63 }
 0x129   : > { %v638_v14 = vadd.f32 %v636_v53, %v633_v17  ;;  %v645_v21 = vadd.f32 %v643_v41, %v640_v18  ;;  %v692_v29 = vpop.permute.xlu1 %691  ;;  %v755_v17 = vpop.permute.xlu0 %754 }
 0x12b   : > { %v646_v22 = vmul.f32 %v638_v14, %v1726_v9  ;;  %v653_v24 = vmul.f32 %v645_v21, %v1726_v9 }
 0x12d   : > { %v654_v28 = vsub.f32 %v653_v24, %v631_v10  ;;  %v647_v20 = vsub.f32 %v646_v22, %v624_v54  ;;  %v748_v56 = vpop.permute.xlu2 %747 }
 0x12f   : > { %v659_v23 = vadd.f32 %v657_v0, %v654_v28  ;;  %v652_v62 = vadd.f32 %v650_v27, %v647_v20 }
 0x131   : > { %v667_v26 = vmul.f32 %v659_v23, %v1726_v9  ;;  %v660_v32 = vmul.f32 %v652_v62, %v1726_v9 }
 0x132   : > { %v706_v39 = vpop.permute.xlu1 %705 }
 0x133   : > { %v668_v34 = vsub.f32 %v667_v26, %v645_v21  ;;  %v661_v35 = vsub.f32 %v660_v32, %v638_v14 }
 0x135   : > { %v673_v36 = vadd.f32 %v671_v16, %v668_v34  ;;  %v666_v37 = vadd.f32 %v664_v52, %v661_v35 }
 0x136   : > { %v769_v5 = vpop.permute.xlu2 %768 }
 0x137   : > { %v681_v13 = vmul.f32 %v673_v36, %v1726_v9  ;;  %v674_v38 = vmul.f32 %v666_v37, %v1726_v9 }
 0x139   : > { %v675_v41 = vsub.f32 %v674_v38, %v652_v62  ;;  %v682_v42 = vsub.f32 %v681_v13, %v659_v23 }
 0x13b   : > { %v680_v43 = vadd.f32 %v678_v2, %v675_v41  ;;  %v687_v25 = vadd.f32 %v685_v40, %v682_v42  ;;  %v727_v44 = vpop.permute.xlu1 %726  ;;  %v790_v40 = vpop.permute.xlu0 %789 }
 0x13d   : > { %v688_v31 = vmul.f32 %v680_v43, %v1726_v9  ;;  %v695_v47 = vmul.f32 %v687_v25, %v1726_v9 }
 0x13f   : > { %v689_v48 = vsub.f32 %v688_v31, %v666_v37  ;;  %v696_v49 = vsub.f32 %v695_v47, %v673_v36  ;;  %v783_v22 = vpop.permute.xlu2 %782 }
 0x141   : > { %v694_v50 = vadd.f32 %v692_v29, %v689_v48  ;;  %v701_v30 = vadd.f32 %v699_v19, %v696_v49 }
 0x143   : > { %v702_v51 = vmul.f32 %v694_v50, %v1726_v9  ;;  %v709_v52 = vmul.f32 %v701_v30, %v1726_v9 }
 0x144   : > { %v741_v6 = vpop.permute.xlu1 %740 }
 0x145   : > { %v703_v53 = vsub.f32 %v702_v51, %v680_v43  ;;  %v710_v55 = vsub.f32 %v709_v52, %v687_v25 }
 0x147   : > { %v708_v57 = vadd.f32 %v706_v39, %v703_v53  ;;  %v715_v1 = vadd.f32 %v713_v33, %v710_v55  ;;  %v825_v53 = vpop.permute.xlu0 %824 }
 0x148   : > { %v804_v35 = vpop.permute.xlu2 %803 }
 0x149   : > { %v716_v3 = vmul.f32 %v708_v57, %v1726_v9  ;;  %v723_v46 = vmul.f32 %v715_v1, %v1726_v9 }
 0x14b   : > { %v724_v60 = vsub.f32 %v723_v46, %v701_v30  ;;  %v717_v61 = vsub.f32 %v716_v3, %v694_v50 }
 0x14d   : > { %v729_v63 = vadd.f32 %v727_v44, %v724_v60  ;;  %v722_v0 = vadd.f32 %v720_v59, %v717_v61  ;;  %v762_v58 = vpop.permute.xlu1 %761 }
 0x14f   : > { %v737_v2 = vmul.f32 %v729_v63, %v1726_v9  ;;  %v730_v4 = vmul.f32 %v722_v0, %v1726_v9 }
 0x151   : > { %v738_v11 = vsub.f32 %v737_v2, %v715_v1  ;;  %v731_v12 = vsub.f32 %v730_v4, %v708_v57  ;;  %v818_v47 = vpop.permute.xlu2 %817 }
 0x153   : > { %v743_v54 = vadd.f32 %v741_v6, %v738_v11  ;;  %v736_v10 = vadd.f32 %v734_v45, %v731_v12 }
 0x155   : > { %v751_v15 = vmul.f32 %v743_v54, %v1726_v9  ;;  %v744_v16 = vmul.f32 %v736_v10, %v1726_v9 }
 0x156   : > { %v776_v28 = vpop.permute.xlu1 %775 }
 0x157   : > { %v745_v18 = vsub.f32 %v744_v16, %v722_v0  ;;  %v752_v19 = vsub.f32 %v751_v15, %v729_v63  ;;  %v412_v63 = vsub.f32 0.0, %v1722_v8 }
 0x159   : > { %v750_v14 = vadd.f32 %v748_v56, %v745_v18  ;;  %v757_v21 = vadd.f32 %v755_v17, %v752_v19 }
 0x15a   : > { %v839_v3 = vpop.permute.xlu2 %838 }
 0x15b   : > { %v758_v24 = vmul.f32 %v750_v14, %v1726_v9  ;;  %v765_v27 = vmul.f32 %v757_v21, %v1726_v9 }
 0x15d   : > { %v759_v20 = vsub.f32 %v758_v24, %v736_v10  ;;  %v766_v23 = vsub.f32 %v765_v27, %v743_v54 }
 0x15f   : > { %v764_v62 = vadd.f32 %v762_v58, %v759_v20  ;;  %v771_v29 = vadd.f32 %v769_v5, %v766_v23  ;;  %v797_v13 = vpop.permute.xlu1 %796 }
 0x161   : > { %v772_v26 = vmul.f32 %v764_v62, %v1726_v9  ;;  %v779_v32 = vmul.f32 %v771_v29, %v1726_v9 }
 0x163   : > { %v780_v33 = vsub.f32 %v779_v32, %v757_v21  ;;  %v773_v34 = vsub.f32 %v772_v26, %v750_v14  ;;  %v853_v58 = vpop.permute.xlu2 %852 }
 0x165   : > { %v785_v36 = vadd.f32 %v783_v22, %v780_v33  ;;  %v778_v37 = vadd.f32 %v776_v28, %v773_v34 }
 0x167   : > { %v793_v38 = vmul.f32 %v785_v36, %v1726_v9  ;;  %v786_v39 = vmul.f32 %v778_v37, %v1726_v9 }
 0x168   : > { %v811_v48 = vpop.permute.xlu1 %810 }
 0x169   : > { %v794_v41 = vsub.f32 %v793_v38, %v771_v29  ;;  %v787_v42 = vsub.f32 %v786_v39, %v764_v62 }
 0x16b   : > { %v799_v43 = vadd.f32 %v797_v13, %v794_v41  ;;  %v792_v25 = vadd.f32 %v790_v40, %v787_v42 }
 0x16d   : > { %v807_v45 = vmul.f32 %v799_v43, %v1726_v9  ;;  %v800_v31 = vmul.f32 %v792_v25, %v1726_v9 }
 0x16f   : > { %v801_v49 = vsub.f32 %v800_v31, %v778_v37  ;;  %v808_v50 = vsub.f32 %v807_v45, %v785_v36 }
 0x171   : > { %v806_v30 = vadd.f32 %v804_v35, %v801_v49  ;;  %v813_v44 = vadd.f32 %v811_v48, %v808_v50  ;;  %v832_v46 = vpop.permute.xlu1 %831 }
 0x173   : > { %v814_v51 = vmul.f32 %v806_v30, %v1726_v9  ;;  %v821_v52 = vmul.f32 %v813_v44, %v1726_v9 }
 0x175   : > { %v815_v55 = vsub.f32 %v814_v51, %v792_v25  ;;  %v822_v56 = vsub.f32 %v821_v52, %v799_v43 }
 0x177   : > { %v820_v57 = vadd.f32 %v818_v47, %v815_v55  ;;  %v827_v1 = vadd.f32 %v825_v53, %v822_v56 }
 0x179   : > { %v828_v6 = vmul.f32 %v820_v57, %v1726_v9  ;;  %v835_v59 = vmul.f32 %v827_v1, %v1726_v9 }
 0x17a   : > { %v846_v15 = vpop.permute.xlu1 %845 }
 0x17b   : > { %v836_v60 = vsub.f32 %v835_v59, %v813_v44  ;;  %v829_v61 = vsub.f32 %v828_v6, %v806_v30 }
 0x17d   : > { %v841_v0 = vadd.f32 %v839_v3, %v836_v60  ;;  %v834_v2 = vadd.f32 %v832_v46, %v829_v61 }
 0x17f   : > { %v857_v4 = vmul.f32 %v841_v0, %v412_v63  ;;  %v860_v5 = vmul.f32 %v841_v0, %v1720_v7  ;;  %v856_v11 = vmul.f32 %v834_v2, %v1720_v7  ;;  %v861_v12 = vmul.f32 %v834_v2, %v412_v63 }
 0x180   : > { %v849_v54 = vmul.f32 %v841_v0, %v1726_v9  ;;  %v842_v10 = vmul.f32 %v834_v2, %v1726_v9 }
 0x181   : > { %v862_v8 = vsub.f32 %v860_v5, %v861_v12  ;;  %v858_v14 = vadd.f32 %v857_v4, %v856_v11 }
 0x182   : > { %v850_v16 = vsub.f32 %v849_v54, %v827_v1  ;;  %v843_v17 = vsub.f32 %v842_v10, %v820_v57 }
 0x184   : > { %v855_v18 = vadd.f32 %v853_v58, %v850_v16  ;;  %v848_v19 = vadd.f32 %v846_v15, %v843_v17 }
 0x186   : > { %v863_v21 = vsub.f32 %v855_v18, %v862_v8  ;;  %v859_v9 = vsub.f32 %v848_v19, %v858_v14 }
 0x188   : > { %v865_v22 = vmul.f32 %v863_v21, %v412_v63  ;;  %v868_v24 = vmul.f32 %v863_v21, %v1720_v7  ;;  %v864_v27 = vmul.f32 %v859_v9, %v1720_v7  ;;  %v869_v28 = vmul.f32 %v859_v9, %v412_v63 }
 0x18a   : > { %v866_v20 = vsub.f32 %v864_v27, %v865_v22  ;;  %v870_v23 = vadd.f32 %v869_v28, %v868_v24 }
 0x18c   : > { %867 = vst [vmem:[%s343_s9] sm:$0xff] %v866_v20 }
 0x18d   : > { %1356 = shalt.err (!%p1353_p3)
}
 0x18e   : > { %1097 = dma.vmem_to_hbm [thread:$0]  (%p1596_p5), %s893_s10, 128, %s895_s24, %s873_s19   ;;  %871 = vst [vmem:[%s350_s11] sm:$0xff] %v870_v23 }
 0x18f   : > { %s878_s9 = scalar_lea.sflag [#allocation9], %s1616_s16  ;;  %s1371_s0 = sshra.s32 %s1853_s14, 4  ;;  %s1372_s0 = int_to_ptr.hbm [resolvable:$true] %s1371_s0 }
 0x190   : > { %s1373_s30 = scalar_lea.hbm %s1372_s0, 8  ;;  %s1377_s7 = scalar_lea.hbm %s1909_s6, 16 }
 0x191   : > { %p1374_p7 = scmp.ne.s32.totalorder %s1372_s0, %s1373_s30  ;;  %p1378_p8 = scmp.lt.s32.totalorder %s1372_s0, %s1909_s6 }
 0x192   : > { %p1379_p1 = scmp.lt.s32.totalorder %s1377_s7, %s1373_s30 }
 0x193   : > { %p1375_p10 = pnand %p1374_p7, %p1596_p5 }
 0x194   : > { %p1380_p4 = por %p1379_p1, %p1378_p8 }
 0x195   : > { %p1376_p2 = pneg %p1375_p10 }
 0x197   : > { %p1381_p11 = pnand %p1380_p4, %p1376_p2 }
 0x199   : > { %1384 = shalt.err (!%p1381_p11)
}
 0x19a   : > { %1098 = dma.vmem_to_hbm [thread:$0]  (%p1596_p5), %s1851_s13, 128, %s1853_s14, %s878_s9  }
 0x19b PF: > { %s922_s16 = sand.u32 1, %s1427_s21   ;;  %p1110_p12 = pnand %p1079_p9, %p1566_p6 }
 0x19c   : > { %s923_s10 = scalar_lea.sflag [#allocation4], %s922_s16 }
 0x19d   : > { %p1111_p13 = pneg %p1110_p12 }
 0x19f   : > { %1418 = dma.done.wait (%p1111_p13), %s923_s10, 128  }
 0x1a0   : > { %1420 = vsyncadd (%p1111_p13), %s923_s10, 4294967168  ;;  %s933_s0 = scalar_lea.sflag [#allocation9], %s922_s16 }
 0x1a1   : > { %1422 = dma.done.wait (%p1111_p13), %s933_s0, 128  }
 0x1a2   : > { %1424 = vsyncadd (%p1111_p13), %s933_s0, 4294967168  ;;  %s27_s26 = sadd.s32 1, %s1447_s26   ;;  %s1919_s21 = smov %s1431_s22 }
 0x1a3   : > { %p24_p0 = scmp.ge.s32.totalorder %s27_s26, 4   ;;  %s1920_s22 = smov %s1435_s23 }
 0x1a4   : > { %s1921_s23 = smov %s1605_s27  ;;  %s1922_s24 = smov %s1443_s25 }
 0x1a5   : > { %s1923_s25 = smov %s1925_s15  ;;  %26 = sbr.rel (!%p24_p0) target bundleno = 11 (0xb), region = 116 }
 0x1aa   :  { %939 = vsyncpa [#allocation3], 1 }
 0x1ab   :  { %941 = vsyncpa [#allocation3 + $0x1], 1 }
 0x1ac   :  { %942 = vsyncpa [#allocation6], 1 }
 0x1ad   :  { %943 = vsyncpa [#allocation4], 1 }
 0x1ae   :  { %945 = vsyncpa [#allocation4 + $0x1], 1 }
 0x1af   :  { %946 = vsyncpa [#allocation9], 1 }
 0x1b0   :  { %948 = vsyncpa [#allocation9 + $0x1], 1 }

</bundles_post_ra>
